<compile_context>
chip_gen: v5e
topology: v5e:2x2
jax: 0.10.0
libtpu: 0.0.40
codegen_flags: <defaults>
</compile_context>

<pallas_src>
import jax
import jax.numpy as jnp
from jax.experimental import pallas as pl
from jax.experimental.pallas import tpu as pltpu


# ----------------------------------------------------------------------------
# Fused Pallas kernel: whole TCN forward for one tile of BT batch rows
# ----------------------------------------------------------------------------
def _tcn_kernel(x_ref, w_in_ref, b_in_ref, w1_ref, b1_ref, w2_ref, b2_ref,
                w_fuse_ref, b_fuse_ref, wl_ref, bl_ref, wa_ref,
                w_out_ref, b_out_ref, out_ref, attn_ref):
    BT, L, _ = x_ref.shape
    H = w_in_ref.shape[1]
    R = BT * L
    bf16 = jnp.bfloat16

    def im2col(h3, K):
        """(BT, L, C) f32 -> (BT*L, K*C) bf16; 'same' zero padding, stride 1."""
        C = h3.shape[-1]
        pad = (K - 1) // 2
        z = jnp.zeros((BT, pad, C), jnp.float32)
        hp = jnp.concatenate([z, h3, z], axis=1)                # (BT, L+2p, C)
        xu = jnp.concatenate([hp[:, k:k + L, :] for k in range(K)], axis=-1)
        return xu.reshape(R, K * C).astype(bf16)

    def mm(a, w_ref):                                           # bf16 x bf16 -> f32 acc
        return jnp.dot(a, w_ref[...], preferred_element_type=jnp.float32)

    relu = lambda v: jnp.maximum(v, 0.0)

    x = x_ref[...].astype(jnp.float32)                          # (BT, L, E)

    # ---- fused MSResNet conv stack (4 matmuls total) -----------------------
    h0 = relu(mm(im2col(x, 3), w_in_ref) + b_in_ref[...])       # (R, H)
    h1 = relu(mm(im2col(h0.reshape(BT, L, H), 7), w1_ref)
              + b1_ref[...])                                    # (R, 3H) all branches
    res = jnp.concatenate([h0, h0, h0], axis=-1)                # per-branch residual
    h2 = relu(mm(im2col(h1.reshape(BT, L, 3 * H), 7), w2_ref)
              + b2_ref[...] + res)                              # (R, 3H)
    feat = relu(mm(h2.astype(bf16), w_fuse_ref) + b_fuse_ref[...])  # (R, H) 1x1 fuse
    feat3 = feat.reshape(BT, L, H)

    # ---- length_fc over the sequence axis ----------------------------------
    wl = wl_ref[...][0]                                         # (L,)
    q = jnp.sum(feat3 * wl[None, :, None], axis=1) + bl_ref[0]  # (BT, H)

    # ---- bilinear dot-product attention + relu(fc) head --------------------
    xa = mm(feat.astype(bf16), wa_ref).reshape(BT, L, H)        # (BT, L, H)
    logits = jnp.sum(xa * q[:, None, :], axis=-1)               # (BT, L)
    m = jnp.max(logits, axis=-1, keepdims=True)
    e = jnp.exp(logits - m)
    p = e / jnp.sum(e, axis=-1, keepdims=True)                  # softmax (f32)
    ctx = jnp.sum(feat3 * p[:, :, None], axis=1)                # (BT, H)
    out = relu(mm(ctx.astype(bf16), w_out_ref) + b_out_ref[...])  # (BT, O)

    out_ref[0] = out.astype(out_ref.dtype)
    attn_ref[0] = p.astype(attn_ref.dtype)


# ----------------------------------------------------------------------------
# Wrapper: weight packing (im2col / merged-branch matrices) + pallas_call
# ----------------------------------------------------------------------------
def _taps_to_matrix(w, k_total, groups=1, group=0):
    """Embed conv taps (ksz, cin, cout) into an im2col weight matrix of shape
    (k_total * groups * cin, cout): taps centered among k_total positions and
    placed in channel group `group`; all other rows are zero."""
    ksz, cin, cout = w.shape
    off = (k_total - ksz) // 2
    big = jnp.zeros((k_total, groups, cin, cout), w.dtype)
    big = big.at[off:off + ksz, group].set(w)
    return big.reshape(k_total * groups * cin, cout)


def _pick_batch_tile(B):
    # prefer an even number of grid steps (v7x has 2 TensorCores) and <= 8
    # batch rows per tile.
    for bt in (8, 4, 2, 1):
        if B % bt == 0 and (B // bt) % 2 == 0:
            return bt
    for bt in (8, 4, 2, 1):
        if B % bt == 0:
            return bt
    return 1


def tcn_forward(tokens, p):
    B, L = tokens.shape
    E = p['embed'].shape[1]
    H = p['w_in'].shape[2]
    O = p['wf'].shape[1]
    bf16 = jnp.bfloat16

    x = p['embed'][tokens]                                      # (B, L, E) gather (XLA)

    # pack conv weights into single-matmul im2col form; the three multi-scale
    # branches are merged into one block-structured matrix per conv stage.
    w_in_m = p['w_in'].reshape(3 * E, H).astype(bf16)           # (3E, H)
    w1_m = jnp.concatenate(
        [_taps_to_matrix(p['branch_%d' % k][0], 7) for k in (3, 5, 7)],
        axis=1).astype(bf16)                                    # (7H, 3H)
    b1_m = jnp.concatenate(
        [p['branch_%d' % k][1] for k in (3, 5, 7)])[None, :]    # (1, 3H)
    w2_m = jnp.concatenate(
        [_taps_to_matrix(p['branch_%d' % k][2], 7, groups=3, group=g)
         for g, k in enumerate((3, 5, 7))], axis=1).astype(bf16)  # (21H, 3H)
    b2_m = jnp.concatenate(
        [p['branch_%d' % k][3] for k in (3, 5, 7)])[None, :]    # (1, 3H)
    w_fuse_m = p['w_fuse'].reshape(3 * H, H).astype(bf16)       # (3H, H)

    b_in = p['b_in'][None, :]                                   # (1, H)  f32
    b_fuse = p['b_fuse'][None, :]                               # (1, H)  f32
    wl = p['wl']                                                # (1, L)  f32
    bl = p['bl'].reshape(1)                                     # (1,)    f32 -> SMEM
    wa = p['wa'].astype(bf16)                                   # (H, H)
    w_out = p['wf'].astype(bf16)                                # (H, O)
    b_out = p['bf']                                             # (1, O)  f32

    BT = _pick_batch_tile(B)
    nb = B // BT
    R = B * L

    def resident(a):                                            # whole array, fetched once
        return pl.BlockSpec(a.shape, lambda i: (0,) * a.ndim)

    flops = (2 * R * (3 * E) * H + 2 * R * (7 * H) * (3 * H)
             + 2 * R * (21 * H) * (3 * H) + 2 * R * (3 * H) * H
             + 2 * R * H * H + 2 * B * H * O)
    operands = (x, w_in_m, b_in, w1_m, b1_m, w2_m, b2_m, w_fuse_m, b_fuse,
                wl, bl, wa, w_out, b_out)
    bytes_accessed = (sum(int(a.size) * a.dtype.itemsize for a in operands)
                      + 4 * (B * O + B * L))
    cost = pl.CostEstimate(flops=flops, transcendentals=B * L,
                           bytes_accessed=bytes_accessed)

    out3, attn3 = pl.pallas_call(
        _tcn_kernel,
        out_shape=(jax.ShapeDtypeStruct((nb, BT, O), jnp.float32),
                   jax.ShapeDtypeStruct((nb, BT, L), jnp.float32)),
        grid=(nb,),
        in_specs=[pl.BlockSpec((BT, L, E), lambda i: (i, 0, 0)),
                  resident(w_in_m), resident(b_in),
                  resident(w1_m), resident(b1_m),
                  resident(w2_m), resident(b2_m),
                  resident(w_fuse_m), resident(b_fuse),
                  resident(wl),
                  pl.BlockSpec(memory_space=pltpu.MemorySpace.SMEM),
                  resident(wa), resident(w_out), resident(b_out)],
        out_specs=(pl.BlockSpec((1, BT, O), lambda i: (i, 0, 0)),
                   pl.BlockSpec((1, BT, L), lambda i: (i, 0, 0))),
        compiler_params=pltpu.CompilerParams(
            dimension_semantics=("parallel",),
            vmem_limit_bytes=32 * 1024 * 1024),
        cost_estimate=cost,
    )(*operands)
    return out3.reshape(B, O), attn3.reshape(B, L)


# ----------------------------------------------------------------------------
# Parameter init (deterministic, PyTorch-like uniform(-1/sqrt(fan_in), ...))
# ----------------------------------------------------------------------------
def init_params(key, vocab, embed, hidden, out_size, fix_length):
    keys = iter(jax.random.split(key, 32))

    def u(shape, fan_in):
        lim = 1.0 / float(fan_in) ** 0.5
        return jax.random.uniform(next(keys), shape, jnp.float32, -lim, lim)

    p = {}
    p['embed'] = jax.random.normal(next(keys), (vocab, embed), jnp.float32)
    p['w_in'] = u((3, embed, hidden), 3 * embed)
    p['b_in'] = u((hidden,), 3 * embed)
    for ksz in (3, 5, 7):
        p['branch_%d' % ksz] = (
            u((ksz, hidden, hidden), ksz * hidden),   # w1
            u((hidden,), ksz * hidden),               # b1
            u((ksz, hidden, hidden), ksz * hidden),   # w2
            u((hidden,), ksz * hidden),               # b2
        )
    p['w_fuse'] = u((1, 3 * hidden, hidden), 3 * hidden)
    p['b_fuse'] = u((hidden,), 3 * hidden)
    p['wl'] = u((1, fix_length), fix_length)          # length_fc weight
    p['bl'] = u((1, 1), fix_length)                   # length_fc bias
    p['wa'] = u((hidden, hidden), hidden)             # attention bilinear weight
    p['wf'] = u((hidden, out_size), hidden)           # final fc weight
    p['bf'] = u((1, out_size), hidden)                # final fc bias
    return p


if __name__ == "__main__":
    # batch, fix_length, vocab, embed, hidden, output
    B, L, V, E, H, O = 8, 16, 50, 32, 32, 4
    root = jax.random.PRNGKey(0)
    k_tok, k_par = jax.random.split(root)
    tokens = jax.random.randint(k_tok, (B, L), 0, V, dtype=jnp.int32)
    params = init_params(k_par, V, E, H, O, L)

    fwd = jax.jit(tcn_forward)
    out, attn = fwd(tokens, params)
    jax.block_until_ready((out, attn))
    assert out.shape == (B, O) and attn.shape == (B, L)
    assert bool(jnp.all(jnp.isfinite(out))) and bool(jnp.all(jnp.isfinite(attn)))
    assert bool(jnp.allclose(jnp.sum(attn, axis=-1), 1.0, atol=1e-3))
    print("KERNEL_OK")
</pallas_src>

<mosaic_0001>
module attributes {stable_mosaic.version = 11 : i64} {
  func.func @_tcn_kernel(%arg0: i32, %arg1: memref<4x16x32xf32, #tpu.memory_space<vmem>>, %arg2: memref<96x32xbf16, #tpu.memory_space<vmem>>, %arg3: memref<1x32xf32, #tpu.memory_space<vmem>>, %arg4: memref<224x96xbf16, #tpu.memory_space<vmem>>, %arg5: memref<1x96xf32, #tpu.memory_space<vmem>>, %arg6: memref<672x96xbf16, #tpu.memory_space<vmem>>, %arg7: memref<1x96xf32, #tpu.memory_space<vmem>>, %arg8: memref<96x32xbf16, #tpu.memory_space<vmem>>, %arg9: memref<1x32xf32, #tpu.memory_space<vmem>>, %arg10: memref<1x16xf32, #tpu.memory_space<vmem>>, %arg11: memref<1xf32, #tpu.memory_space<smem>>, %arg12: memref<32x32xbf16, #tpu.memory_space<vmem>>, %arg13: memref<32x4xbf16, #tpu.memory_space<vmem>>, %arg14: memref<1x4xf32, #tpu.memory_space<vmem>>, %arg15: memref<1x4x4xf32, #tpu.memory_space<vmem>>, %arg16: memref<1x4x16xf32, #tpu.memory_space<vmem>>) attributes {dimension_semantics = [#tpu.dimension_semantics<parallel>], iteration_bounds = array<i64: 2>, scalar_prefetch = 0 : i64, scratch_operands = 0 : i64, tpu.core_type = #tpu.core_type<tc>, window_params = [{transform_indices = @transform_0, window_bounds = array<i64: 4, 16, 32>}, {pipeline_mode = #tpu.pipeline_mode<synchronous>, transform_indices = @transform_1, window_bounds = array<i64: 96, 32>}, {pipeline_mode = #tpu.pipeline_mode<synchronous>, transform_indices = @transform_2, window_bounds = array<i64: 1, 32>}, {pipeline_mode = #tpu.pipeline_mode<synchronous>, transform_indices = @transform_3, window_bounds = array<i64: 224, 96>}, {pipeline_mode = #tpu.pipeline_mode<synchronous>, transform_indices = @transform_4, window_bounds = array<i64: 1, 96>}, {pipeline_mode = #tpu.pipeline_mode<synchronous>, transform_indices = @transform_5, window_bounds = array<i64: 672, 96>}, {pipeline_mode = #tpu.pipeline_mode<synchronous>, transform_indices = @transform_6, window_bounds = array<i64: 1, 96>}, {pipeline_mode = #tpu.pipeline_mode<synchronous>, transform_indices = @transform_7, window_bounds = array<i64: 96, 32>}, {pipeline_mode = #tpu.pipeline_mode<synchronous>, transform_indices = @transform_8, window_bounds = array<i64: 1, 32>}, {pipeline_mode = #tpu.pipeline_mode<synchronous>, transform_indices = @transform_9, window_bounds = array<i64: 1, 16>}, {transform_indices = @transform_10, window_bounds = array<i64: 1>}, {pipeline_mode = #tpu.pipeline_mode<synchronous>, transform_indices = @transform_11, window_bounds = array<i64: 32, 32>}, {pipeline_mode = #tpu.pipeline_mode<synchronous>, transform_indices = @transform_12, window_bounds = array<i64: 32, 4>}, {pipeline_mode = #tpu.pipeline_mode<synchronous>, transform_indices = @transform_13, window_bounds = array<i64: 1, 4>}, {transform_indices = @transform_14, window_bounds = array<i64: 1, 4, 4>}, {transform_indices = @transform_15, window_bounds = array<i64: 1, 4, 16>}]} {
    %c0 = arith.constant 0 : index
    %c0_0 = arith.constant 0 : index
    %c0_1 = arith.constant 0 : index
    %0 = vector.load %arg1[%c0, %c0_0, %c0_1] : memref<4x16x32xf32, #tpu.memory_space<vmem>>, vector<4x16x32xf32>
    %cst = arith.constant 0.000000e+00 : f32
    %1 = vector.broadcast %cst : f32 to vector<4x1x32xf32>
    %2 = tpu.concatenate %1, %0, %1 in 1 : vector<4x1x32xf32>, vector<4x16x32xf32>, vector<4x1x32xf32> -> vector<4x18x32xf32>
    %3 = vector.extract_strided_slice %2 {offsets = [0, 0, 0], sizes = [4, 16, 32], strides = [1, 1, 1]} : vector<4x18x32xf32> to vector<4x16x32xf32>
    %4 = vector.extract_strided_slice %2 {offsets = [0, 1, 0], sizes = [4, 16, 32], strides = [1, 1, 1]} : vector<4x18x32xf32> to vector<4x16x32xf32>
    %5 = vector.extract_strided_slice %2 {offsets = [0, 2, 0], sizes = [4, 16, 32], strides = [1, 1, 1]} : vector<4x18x32xf32> to vector<4x16x32xf32>
    %6 = tpu.concatenate %3, %4, %5 in 2 : vector<4x16x32xf32>, vector<4x16x32xf32>, vector<4x16x32xf32> -> vector<4x16x96xf32>
    %7 = vector.shape_cast %6 : vector<4x16x96xf32> to vector<64x96xf32>
    %8 = arith.truncf %7 : vector<64x96xf32> to vector<64x96xbf16>
    %c0_2 = arith.constant 0 : index
    %c0_3 = arith.constant 0 : index
    %9 = vector.load %arg2[%c0_2, %c0_3] : memref<96x32xbf16, #tpu.memory_space<vmem>>, vector<96x32xbf16>
    %cst_4 = arith.constant dense<0.000000e+00> : vector<64x32xf32>
    %10 = tpu.matmul %8, %9, %cst_4 {dimension_numbers = #tpu.dot_dimension_numbers<[1], [0], [0], [1], [0, 0, 1, 1], [], []>} : vector<64x96xbf16>, vector<96x32xbf16>, vector<64x32xf32> -> vector<64x32xf32>
    %c0_5 = arith.constant 0 : index
    %c0_6 = arith.constant 0 : index
    %11 = vector.load %arg3[%c0_5, %c0_6] : memref<1x32xf32, #tpu.memory_space<vmem>>, vector<1x32xf32>
    %12 = vector.broadcast %11 : vector<1x32xf32> to vector<64x32xf32>
    %13 = arith.addf %10, %12 : vector<64x32xf32>
    %cst_7 = arith.constant 0.000000e+00 : f32
    %14 = vector.broadcast %cst_7 : f32 to vector<64x32xf32>
    %15 = arith.maximumf %13, %14 : vector<64x32xf32>
    %16 = vector.shape_cast %15 : vector<64x32xf32> to vector<4x16x32xf32>
    %cst_8 = arith.constant 0.000000e+00 : f32
    %17 = vector.broadcast %cst_8 : f32 to vector<4x3x32xf32>
    %18 = tpu.concatenate %17, %16, %17 in 1 : vector<4x3x32xf32>, vector<4x16x32xf32>, vector<4x3x32xf32> -> vector<4x22x32xf32>
    %19 = vector.extract_strided_slice %18 {offsets = [0, 0, 0], sizes = [4, 16, 32], strides = [1, 1, 1]} : vector<4x22x32xf32> to vector<4x16x32xf32>
    %20 = vector.extract_strided_slice %18 {offsets = [0, 1, 0], sizes = [4, 16, 32], strides = [1, 1, 1]} : vector<4x22x32xf32> to vector<4x16x32xf32>
    %21 = vector.extract_strided_slice %18 {offsets = [0, 2, 0], sizes = [4, 16, 32], strides = [1, 1, 1]} : vector<4x22x32xf32> to vector<4x16x32xf32>
    %22 = vector.extract_strided_slice %18 {offsets = [0, 3, 0], sizes = [4, 16, 32], strides = [1, 1, 1]} : vector<4x22x32xf32> to vector<4x16x32xf32>
    %23 = vector.extract_strided_slice %18 {offsets = [0, 4, 0], sizes = [4, 16, 32], strides = [1, 1, 1]} : vector<4x22x32xf32> to vector<4x16x32xf32>
    %24 = vector.extract_strided_slice %18 {offsets = [0, 5, 0], sizes = [4, 16, 32], strides = [1, 1, 1]} : vector<4x22x32xf32> to vector<4x16x32xf32>
    %25 = vector.extract_strided_slice %18 {offsets = [0, 6, 0], sizes = [4, 16, 32], strides = [1, 1, 1]} : vector<4x22x32xf32> to vector<4x16x32xf32>
    %26 = tpu.concatenate %19, %20, %21, %22, %23, %24, %25 in 2 : vector<4x16x32xf32>, vector<4x16x32xf32>, vector<4x16x32xf32>, vector<4x16x32xf32>, vector<4x16x32xf32>, vector<4x16x32xf32>, vector<4x16x32xf32> -> vector<4x16x224xf32>
    %27 = vector.shape_cast %26 : vector<4x16x224xf32> to vector<64x224xf32>
    %28 = arith.truncf %27 : vector<64x224xf32> to vector<64x224xbf16>
    %c0_9 = arith.constant 0 : index
    %c0_10 = arith.constant 0 : index
    %29 = vector.load %arg4[%c0_9, %c0_10] : memref<224x96xbf16, #tpu.memory_space<vmem>>, vector<224x96xbf16>
    %cst_11 = arith.constant dense<0.000000e+00> : vector<64x96xf32>
    %30 = tpu.matmul %28, %29, %cst_11 {dimension_numbers = #tpu.dot_dimension_numbers<[1], [0], [0], [1], [0, 0, 1, 1], [], []>} : vector<64x224xbf16>, vector<224x96xbf16>, vector<64x96xf32> -> vector<64x96xf32>
    %c0_12 = arith.constant 0 : index
    %c0_13 = arith.constant 0 : index
    %31 = vector.load %arg5[%c0_12, %c0_13] : memref<1x96xf32, #tpu.memory_space<vmem>>, vector<1x96xf32>
    %32 = vector.broadcast %31 : vector<1x96xf32> to vector<64x96xf32>
    %33 = arith.addf %30, %32 : vector<64x96xf32>
    %cst_14 = arith.constant 0.000000e+00 : f32
    %34 = vector.broadcast %cst_14 : f32 to vector<64x96xf32>
    %35 = arith.maximumf %33, %34 : vector<64x96xf32>
    %36 = tpu.concatenate %15, %15, %15 in 1 : vector<64x32xf32>, vector<64x32xf32>, vector<64x32xf32> -> vector<64x96xf32>
    %37 = vector.shape_cast %35 : vector<64x96xf32> to vector<4x16x96xf32>
    %cst_15 = arith.constant 0.000000e+00 : f32
    %38 = vector.broadcast %cst_15 : f32 to vector<4x3x96xf32>
    %39 = tpu.concatenate %38, %37, %38 in 1 : vector<4x3x96xf32>, vector<4x16x96xf32>, vector<4x3x96xf32> -> vector<4x22x96xf32>
    %40 = vector.extract_strided_slice %39 {offsets = [0, 0, 0], sizes = [4, 16, 96], strides = [1, 1, 1]} : vector<4x22x96xf32> to vector<4x16x96xf32>
    %41 = vector.extract_strided_slice %39 {offsets = [0, 1, 0], sizes = [4, 16, 96], strides = [1, 1, 1]} : vector<4x22x96xf32> to vector<4x16x96xf32>
    %42 = vector.extract_strided_slice %39 {offsets = [0, 2, 0], sizes = [4, 16, 96], strides = [1, 1, 1]} : vector<4x22x96xf32> to vector<4x16x96xf32>
    %43 = vector.extract_strided_slice %39 {offsets = [0, 3, 0], sizes = [4, 16, 96], strides = [1, 1, 1]} : vector<4x22x96xf32> to vector<4x16x96xf32>
    %44 = vector.extract_strided_slice %39 {offsets = [0, 4, 0], sizes = [4, 16, 96], strides = [1, 1, 1]} : vector<4x22x96xf32> to vector<4x16x96xf32>
    %45 = vector.extract_strided_slice %39 {offsets = [0, 5, 0], sizes = [4, 16, 96], strides = [1, 1, 1]} : vector<4x22x96xf32> to vector<4x16x96xf32>
    %46 = vector.extract_strided_slice %39 {offsets = [0, 6, 0], sizes = [4, 16, 96], strides = [1, 1, 1]} : vector<4x22x96xf32> to vector<4x16x96xf32>
    %47 = tpu.concatenate %40, %41, %42, %43, %44, %45, %46 in 2 : vector<4x16x96xf32>, vector<4x16x96xf32>, vector<4x16x96xf32>, vector<4x16x96xf32>, vector<4x16x96xf32>, vector<4x16x96xf32>, vector<4x16x96xf32> -> vector<4x16x672xf32>
    %48 = vector.shape_cast %47 : vector<4x16x672xf32> to vector<64x672xf32>
    %49 = arith.truncf %48 : vector<64x672xf32> to vector<64x672xbf16>
    %c0_16 = arith.constant 0 : index
    %c0_17 = arith.constant 0 : index
    %50 = vector.load %arg6[%c0_16, %c0_17] : memref<672x96xbf16, #tpu.memory_space<vmem>>, vector<672x96xbf16>
    %cst_18 = arith.constant dense<0.000000e+00> : vector<64x96xf32>
    %51 = tpu.matmul %49, %50, %cst_18 {dimension_numbers = #tpu.dot_dimension_numbers<[1], [0], [0], [1], [0, 0, 1, 1], [], []>} : vector<64x672xbf16>, vector<672x96xbf16>, vector<64x96xf32> -> vector<64x96xf32>
    %c0_19 = arith.constant 0 : index
    %c0_20 = arith.constant 0 : index
    %52 = vector.load %arg7[%c0_19, %c0_20] : memref<1x96xf32, #tpu.memory_space<vmem>>, vector<1x96xf32>
    %53 = vector.broadcast %52 : vector<1x96xf32> to vector<64x96xf32>
    %54 = arith.addf %51, %53 : vector<64x96xf32>
    %55 = arith.addf %54, %36 : vector<64x96xf32>
    %cst_21 = arith.constant 0.000000e+00 : f32
    %56 = vector.broadcast %cst_21 : f32 to vector<64x96xf32>
    %57 = arith.maximumf %55, %56 : vector<64x96xf32>
    %58 = arith.truncf %57 : vector<64x96xf32> to vector<64x96xbf16>
    %c0_22 = arith.constant 0 : index
    %c0_23 = arith.constant 0 : index
    %59 = vector.load %arg8[%c0_22, %c0_23] : memref<96x32xbf16, #tpu.memory_space<vmem>>, vector<96x32xbf16>
    %cst_24 = arith.constant dense<0.000000e+00> : vector<64x32xf32>
    %60 = tpu.matmul %58, %59, %cst_24 {dimension_numbers = #tpu.dot_dimension_numbers<[1], [0], [0], [1], [0, 0, 1, 1], [], []>} : vector<64x96xbf16>, vector<96x32xbf16>, vector<64x32xf32> -> vector<64x32xf32>
    %c0_25 = arith.constant 0 : index
    %c0_26 = arith.constant 0 : index
    %61 = vector.load %arg9[%c0_25, %c0_26] : memref<1x32xf32, #tpu.memory_space<vmem>>, vector<1x32xf32>
    %62 = vector.broadcast %61 : vector<1x32xf32> to vector<64x32xf32>
    %63 = arith.addf %60, %62 : vector<64x32xf32>
    %cst_27 = arith.constant 0.000000e+00 : f32
    %64 = vector.broadcast %cst_27 : f32 to vector<64x32xf32>
    %65 = arith.maximumf %63, %64 : vector<64x32xf32>
    %66 = vector.shape_cast %65 : vector<64x32xf32> to vector<4x16x32xf32>
    %c0_28 = arith.constant 0 : index
    %c0_29 = arith.constant 0 : index
    %67 = vector.load %arg10[%c0_28, %c0_29] : memref<1x16xf32, #tpu.memory_space<vmem>>, vector<1x16xf32>
    %68 = vector.shape_cast %67 : vector<1x16xf32> to vector<16xf32>
    %69 = vector.shape_cast %68 : vector<16xf32> to vector<1x16x1xf32>
    %70 = vector.broadcast %69 : vector<1x16x1xf32> to vector<4x16x32xf32>
    %71 = arith.mulf %66, %70 : vector<4x16x32xf32>
    %cst_30 = arith.constant dense<0.000000e+00> : vector<4x32xf32>
    %72 = vector.multi_reduction <add>, %71, %cst_30 [1] : vector<4x16x32xf32> to vector<4x32xf32>
    %c0_31 = arith.constant 0 : index
    %73 = memref.load %arg11[%c0_31] : memref<1xf32, #tpu.memory_space<smem>>
    %74 = vector.broadcast %73 : f32 to vector<4x32xf32>
    %75 = arith.addf %72, %74 : vector<4x32xf32>
    %76 = arith.truncf %65 : vector<64x32xf32> to vector<64x32xbf16>
    %c0_32 = arith.constant 0 : index
    %c0_33 = arith.constant 0 : index
    %77 = vector.load %arg12[%c0_32, %c0_33] : memref<32x32xbf16, #tpu.memory_space<vmem>>, vector<32x32xbf16>
    %cst_34 = arith.constant dense<0.000000e+00> : vector<64x32xf32>
    %78 = tpu.matmul %76, %77, %cst_34 {dimension_numbers = #tpu.dot_dimension_numbers<[1], [0], [0], [1], [0, 0, 1, 1], [], []>} : vector<64x32xbf16>, vector<32x32xbf16>, vector<64x32xf32> -> vector<64x32xf32>
    %79 = vector.shape_cast %78 : vector<64x32xf32> to vector<4x16x32xf32>
    %80 = vector.shape_cast %75 : vector<4x32xf32> to vector<4x1x32xf32>
    %81 = vector.broadcast %80 : vector<4x1x32xf32> to vector<4x16x32xf32>
    %82 = arith.mulf %79, %81 : vector<4x16x32xf32>
    %cst_35 = arith.constant dense<0.000000e+00> : vector<4x16xf32>
    %83 = vector.multi_reduction <add>, %82, %cst_35 [2] : vector<4x16x32xf32> to vector<4x16xf32>
    %cst_36 = arith.constant dense<0xFF800000> : vector<4xf32>
    %84 = vector.multi_reduction <maximumf>, %83, %cst_36 [1] : vector<4x16xf32> to vector<4xf32>
    %85 = vector.shape_cast %84 : vector<4xf32> to vector<4x1xf32>
    %86 = vector.broadcast %85 : vector<4x1xf32> to vector<4x16xf32>
    %87 = arith.subf %83, %86 : vector<4x16xf32>
    %88 = math.exp %87 : vector<4x16xf32>
    %cst_37 = arith.constant dense<0.000000e+00> : vector<4xf32>
    %89 = vector.multi_reduction <add>, %88, %cst_37 [1] : vector<4x16xf32> to vector<4xf32>
    %90 = vector.shape_cast %89 : vector<4xf32> to vector<4x1xf32>
    %91 = vector.broadcast %90 : vector<4x1xf32> to vector<4x16xf32>
    %92 = arith.divf %88, %91 : vector<4x16xf32>
    %93 = vector.shape_cast %92 : vector<4x16xf32> to vector<4x16x1xf32>
    %94 = vector.broadcast %93 : vector<4x16x1xf32> to vector<4x16x32xf32>
    %95 = arith.mulf %66, %94 : vector<4x16x32xf32>
    %cst_38 = arith.constant dense<0.000000e+00> : vector<4x32xf32>
    %96 = vector.multi_reduction <add>, %95, %cst_38 [1] : vector<4x16x32xf32> to vector<4x32xf32>
    %97 = arith.truncf %96 : vector<4x32xf32> to vector<4x32xbf16>
    %c0_39 = arith.constant 0 : index
    %c0_40 = arith.constant 0 : index
    %98 = vector.load %arg13[%c0_39, %c0_40] : memref<32x4xbf16, #tpu.memory_space<vmem>>, vector<32x4xbf16>
    %cst_41 = arith.constant dense<0.000000e+00> : vector<4x4xf32>
    %99 = tpu.matmul %97, %98, %cst_41 {dimension_numbers = #tpu.dot_dimension_numbers<[1], [0], [0], [1], [0, 0, 1, 1], [], []>} : vector<4x32xbf16>, vector<32x4xbf16>, vector<4x4xf32> -> vector<4x4xf32>
    %c0_42 = arith.constant 0 : index
    %c0_43 = arith.constant 0 : index
    %100 = vector.load %arg14[%c0_42, %c0_43] : memref<1x4xf32, #tpu.memory_space<vmem>>, vector<1x4xf32>
    %101 = vector.broadcast %100 : vector<1x4xf32> to vector<4x4xf32>
    %102 = arith.addf %99, %101 : vector<4x4xf32>
    %cst_44 = arith.constant 0.000000e+00 : f32
    %103 = vector.broadcast %cst_44 : f32 to vector<4x4xf32>
    %104 = arith.maximumf %102, %103 : vector<4x4xf32>
    %c0_45 = arith.constant 0 : index
    %c0_46 = arith.constant 0 : index
    %c0_47 = arith.constant 0 : index
    %105 = vector.load %arg15[%c0_45, %c0_46, %c0_47] : memref<1x4x4xf32, #tpu.memory_space<vmem>>, vector<1x4x4xf32>
    %106 = vector.shape_cast %105 : vector<1x4x4xf32> to vector<4x4xf32>
    %107 = vector.shape_cast %104 : vector<4x4xf32> to vector<1x4x4xf32>
    tpu.vector_store %arg15[%c0_45, %c0_46, %c0_47], %107 {strides = array<i32>} : memref<1x4x4xf32, #tpu.memory_space<vmem>>, vector<1x4x4xf32>,
    %c0_48 = arith.constant 0 : index
    %c0_49 = arith.constant 0 : index
    %c0_50 = arith.constant 0 : index
    %108 = vector.load %arg16[%c0_48, %c0_49, %c0_50] : memref<1x4x16xf32, #tpu.memory_space<vmem>>, vector<1x4x16xf32>
    %109 = vector.shape_cast %108 : vector<1x4x16xf32> to vector<4x16xf32>
    %110 = vector.shape_cast %92 : vector<4x16xf32> to vector<1x4x16xf32>
    tpu.vector_store %arg16[%c0_48, %c0_49, %c0_50], %110 {strides = array<i32>} : memref<1x4x16xf32, #tpu.memory_space<vmem>>, vector<1x4x16xf32>,
    return
  }
  func.func @transform_0(%arg0: i32) -> (i32, i32, i32) {
    %c0_i32 = arith.constant 0 : i32
    %c0_i32_0 = arith.constant 0 : i32
    %c0_i32_1 = arith.constant 0 : i32
    return %arg0, %c0_i32, %c0_i32_0 : i32, i32, i32
  }
  func.func @transform_1(%arg0: i32) -> (i32, i32) {
    %c0_i32 = arith.constant 0 : i32
    %c0_i32_0 = arith.constant 0 : i32
    %c0_i32_1 = arith.constant 0 : i32
    return %c0_i32, %c0_i32_0 : i32, i32
  }
  func.func @transform_2(%arg0: i32) -> (i32, i32) {
    %c0_i32 = arith.constant 0 : i32
    %c0_i32_0 = arith.constant 0 : i32
    %c0_i32_1 = arith.constant 0 : i32
    return %c0_i32, %c0_i32_0 : i32, i32
  }
  func.func @transform_3(%arg0: i32) -> (i32, i32) {
    %c0_i32 = arith.constant 0 : i32
    %c0_i32_0 = arith.constant 0 : i32
    %c0_i32_1 = arith.constant 0 : i32
    return %c0_i32, %c0_i32_0 : i32, i32
  }
  func.func @transform_4(%arg0: i32) -> (i32, i32) {
    %c0_i32 = arith.constant 0 : i32
    %c0_i32_0 = arith.constant 0 : i32
    %c0_i32_1 = arith.constant 0 : i32
    return %c0_i32, %c0_i32_0 : i32, i32
  }
  func.func @transform_5(%arg0: i32) -> (i32, i32) {
    %c0_i32 = arith.constant 0 : i32
    %c0_i32_0 = arith.constant 0 : i32
    %c0_i32_1 = arith.constant 0 : i32
    return %c0_i32, %c0_i32_0 : i32, i32
  }
  func.func @transform_6(%arg0: i32) -> (i32, i32) {
    %c0_i32 = arith.constant 0 : i32
    %c0_i32_0 = arith.constant 0 : i32
    %c0_i32_1 = arith.constant 0 : i32
    return %c0_i32, %c0_i32_0 : i32, i32
  }
  func.func @transform_7(%arg0: i32) -> (i32, i32) {
    %c0_i32 = arith.constant 0 : i32
    %c0_i32_0 = arith.constant 0 : i32
    %c0_i32_1 = arith.constant 0 : i32
    return %c0_i32, %c0_i32_0 : i32, i32
  }
  func.func @transform_8(%arg0: i32) -> (i32, i32) {
    %c0_i32 = arith.constant 0 : i32
    %c0_i32_0 = arith.constant 0 : i32
    %c0_i32_1 = arith.constant 0 : i32
    return %c0_i32, %c0_i32_0 : i32, i32
  }
  func.func @transform_9(%arg0: i32) -> (i32, i32) {
    %c0_i32 = arith.constant 0 : i32
    %c0_i32_0 = arith.constant 0 : i32
    %c0_i32_1 = arith.constant 0 : i32
    return %c0_i32, %c0_i32_0 : i32, i32
  }
  func.func @transform_10(%arg0: i32) -> i32 {
    %c0_i32 = arith.constant 0 : i32
    %c0_i32_0 = arith.constant 0 : i32
    return %c0_i32 : i32
  }
  func.func @transform_11(%arg0: i32) -> (i32, i32) {
    %c0_i32 = arith.constant 0 : i32
    %c0_i32_0 = arith.constant 0 : i32
    %c0_i32_1 = arith.constant 0 : i32
    return %c0_i32, %c0_i32_0 : i32, i32
  }
  func.func @transform_12(%arg0: i32) -> (i32, i32) {
    %c0_i32 = arith.constant 0 : i32
    %c0_i32_0 = arith.constant 0 : i32
    %c0_i32_1 = arith.constant 0 : i32
    return %c0_i32, %c0_i32_0 : i32, i32
  }
  func.func @transform_13(%arg0: i32) -> (i32, i32) {
    %c0_i32 = arith.constant 0 : i32
    %c0_i32_0 = arith.constant 0 : i32
    %c0_i32_1 = arith.constant 0 : i32
    return %c0_i32, %c0_i32_0 : i32, i32
  }
  func.func @transform_14(%arg0: i32) -> (i32, i32, i32) {
    %c0_i32 = arith.constant 0 : i32
    %c0_i32_0 = arith.constant 0 : i32
    %c0_i32_1 = arith.constant 0 : i32
    return %arg0, %c0_i32, %c0_i32_0 : i32, i32, i32
  }
  func.func @transform_15(%arg0: i32) -> (i32, i32, i32) {
    %c0_i32 = arith.constant 0 : i32
    %c0_i32_0 = arith.constant 0 : i32
    %c0_i32_1 = arith.constant 0 : i32
    return %arg0, %c0_i32, %c0_i32_0 : i32, i32, i32
  }
}

</mosaic_0001>

<bundles_post_ra>
// kernel: tcn_forward.1
= control target key start
LH: loop header
LB: loop body
LE: loop exit
PB: predicated region body
PF: predicated region fallthrough
CT: control target
= control target key end

     0   :  { %s5127_s0 = inlined_call_operand.vmem [shape: f32[8,16,32], index: 0, kind: input, shape index: {}]   ;;  %s5128_s1 = inlined_call_operand.vmem [shape: bf16[96,32], index: 1, kind: input, shape index: {}]   ;;  %s5129_s2 = inlined_call_operand.vmem [shape: f32[1,32], index: 2, kind: input, shape index: {}]   ;;  %s5130_s3 = inlined_call_operand.vmem [shape: bf16[224,96], index: 3, kind: input, shape index: {}]   ;;  %s5131_s4 = inlined_call_operand.vmem [shape: f32[1,96], index: 4, kind: input, shape index: {}]   ;;  %s5132_s5 = inlined_call_operand.vmem [shape: bf16[672,96], index: 5, kind: input, shape index: {}]   ;;  %s5133_s6 = inlined_call_operand.vmem [shape: f32[1,96], index: 6, kind: input, shape index: {}]   ;;  %s5134_s7 = inlined_call_operand.vmem [shape: bf16[96,32], index: 7, kind: input, shape index: {}]   ;;  %s5135_s8 = inlined_call_operand.vmem [shape: f32[1,32], index: 8, kind: input, shape index: {}]   ;;  %s5136_s9 = inlined_call_operand.vmem [shape: f32[1,16], index: 9, kind: input, shape index: {}]   ;;  %s5137_s10 = inlined_call_operand.<no memory space> [shape: f32[1], index: 10, kind: input, shape index: {}]   ;;  %s5138_s11 = inlined_call_operand.vmem [shape: bf16[32,32], index: 11, kind: input, shape index: {}]   ;;  %s5139_s12 = inlined_call_operand.vmem [shape: bf16[32,4], index: 12, kind: input, shape index: {}]   ;;  %s5140_s13 = inlined_call_operand.vmem [shape: f32[1,4], index: 13, kind: input, shape index: {}]   ;;  %s5141_s14 = inlined_call_operand.vmem [shape: f32[2,4,4], index: 14, kind: output, shape index: {0}]   ;;  %s5142_s15 = inlined_call_operand.hbm [shape: f32[2,4,16], index: 15, kind: output, shape index: {1}]  }
   0x1   :  { %5150 = sst [smem:[#allocation9_spill]] %s5127_s0 }
   0x2   :  { %5151 = sst [smem:[#allocation10_spill]] %s5128_s1 }
   0x3   :  { %5152 = sst [smem:[#allocation11_spill]] %s5129_s2 }
   0x4   :  { %5153 = sst [smem:[#allocation12_spill]] %s5130_s3 }
   0x5   :  { %5154 = sst [smem:[#allocation13_spill]] %s5131_s4 }
   0x6   :  { %21 = sst [smem:[#allocation2]] %s5137_s10 }
   0x7   :  { %22 = vsyncpa [#allocation4], 0 }
   0x8   :  { %24 = vsyncpa [#allocation4 + $0x1], 0  ;;  %s3878_s20 = smov 0   ;;  %s3880_s21 = smov 0  }
   0x9   :  { %s3882_s22 = smov 0   ;;  %s3884_s23 = smov 0  }
   0xa LB: > { %5155 = sst [smem:[#allocation6_spill]] %s3785_s22  ;;  %s3899_s10 = sadd.s32 4294967295, %s3789_s23   ;;  %s3789_s23 = sphi %s3884_s23, %s5167_s23   ;;  %s3785_s22 = sphi %s3882_s22, %s5169_s22   ;;  %s3781_s21 = sphi %s3880_s21, %s5171_s21   ;;  %s3777_s20 = sphi %s3878_s20, %s5170_s20  }
   0xb   : > { %s3006_s24 = sadd.s32 4294967294, %s3789_s23   ;;  %s3903_s25 = sadd.s32 1, %s3789_s23  }
   0xc   : > { %5156 = sst [smem:[#allocation7_spill]] %s3903_s25  ;;  %s362_s26 = sadd.s32 1, %s3785_s22 }
   0xd   : > { %s359_s27 = ssub.s32 %s3789_s23, %s3903_s25  ;;  %p372_p0 = scmp.ne.s32.totalorder %s3785_s22, %s3781_s21 }
   0xe   : > { %p360_p1 = scmp.eq.s32.totalorder %s359_s27, 0  ;;  %p373_p2 = scmp.eq.s32.totalorder %s3899_s10, 1 }
   0xf   : > { %p378_p3 = scmp.ne.s32.totalorder %s3781_s21, %s3777_s20  ;;  %p379_p4 = scmp.eq.s32.totalorder %s3006_s24, 1 }
  0x10   : > { %s3914_s28 = scalar_select %p360_p1, %s3785_s22, %s362_s26  }
  0x11   : > { %p3916_p5 = por %p373_p2, %p372_p0  ;;  %p3920_p6 = por %p379_p4, %p378_p3 }
  0x12   : > { %5157 = sst [smem:[#allocation8_spill]] %s3914_s28  ;;  %p3009_p7 = scmp.ge.s32.totalorder %s3789_s23, 1 }
  0x13   : > { %p446_p8 = scmp.lt.s32.totalorder %s3789_s23, 3 }
  0x15   : > { %p447_p9 = pnand %p3009_p7, %p446_p8 }
  0x16   : > { %s3927_s16 = sshll.u32 (!%p447_p9), %s3899_s10, 2  ;;  %s5160_s1 = sld [smem:[#allocation10_spill]] (!%p447_p9) }
  0x17   : > { %450 = sbr.rel (%p447_p9) target bundleno = 2091 (0x82b), region = 76  ;;  %p500_p10 = scmp.lt.s32.totalorder (!%p447_p9), %s3927_s16, 7 }
  0x18   : > { %s5161_s0 = sld [smem:[#allocation9_spill]] (!%p447_p9)  ;;  %s5146_s19 = smov (!%p447_p9), 96  }
  0x19   : > { %s5162_s2 = sld [smem:[#allocation11_spill]] (!%p447_p9)  ;;  %s5165_s22 = smov (!%p447_p9), 96  }
  0x1a   : > { %s5163_s3 = sld [smem:[#allocation12_spill]] (!%p447_p9)  ;;  %s5166_s18 = smov (!%p447_p9), 32  }
  0x1b   : > { %s5164_s4 = sld [smem:[#allocation13_spill]] (!%p447_p9)  ;;  %s496_s26 = sand.u32 (!%p447_p9), 1, %s3781_s21  }
  0x1c   : > { %s501_s17 = scalar_select %p500_p10, %s3927_s16, 7  ;;  %v3334_v0 = vld [vmem:[%s5160_s1 + $0x28] sm:$0xff]  ;;  %v3333_v1 = vld [vmem:[%s5160_s1 + $0x20] sm:$0xff]  ;;  %vm527_vm0 = vcmask 1040384   ;;  %vm568_vm1 = vcmask 1046528   ;;  %vm613_vm2 = vcmask 1045504  }
  0x1d   : > { %747 = vmatpush.bf16.msra.mxu0 %v3334_v0  ;;  %v3332_v14 = vld [vmem:[%s5160_s1 + $0x18] sm:$0xff]  ;;  %vm658_vm3 = vcmask 261120   ;;  %vm667_vm4 = vcmask 523264   ;;  %vm732_vm5 = vcmask 785408   ;;  %vm790_vm6 = vcmask 1042432  }
  0x1e   : > { %s3328_s24 = sshll.u32 %s501_s17, 4  ;;  %s5148_s17 = smov 32   ;;  %vm1037_vm7 = vcmask 1041408   ;;  %vm919_vm8 = vcmask 1044480   ;;  %vm964_vm9 = vcmask 1043456   ;;  %vm2565_vm10 = vcmask 130112  }
  0x1f   : > { %s3940_s25 = scalar_lea.vmem %s5161_s0, %s3328_s24  ;;  %s2453_s0 = sld [smem:[#allocation2]]  ;;  %vm2576_vm11 = vcmask 1041409   ;;  %vm2578_vm12 = vcmask 1042434   ;;  %vm2580_vm13 = vcmask 1043459   ;;  %vm2583_vm14 = vcmask 125952  }
  0x20   : > { %v511_v2 = vld [vmem:[%s3940_s25] sm:$0xff]  ;;  %v512_v3 = vld [vmem:[%s3940_s25 + $0x8] sm:$0xff]  ;;  %v513_v4 = vld [vmem:[%s3940_s25 + $0x10] sm:$0xff] }
  0x21   : > { %v528_v5 = vrot.slane %v511_v2, 7  ;;  %v529_v6 = vrot.slane %v512_v3, 7  ;;  %v514_v7 = vld [vmem:[%s3940_s25 + $0x18] sm:$0xff]  ;;  %v531_v8 = vrot.slane %v513_v4, 7  ;;  %v515_v9 = vld [vmem:[%s3940_s25 + $0x20] sm:$0xff]  ;;  %v516_v10 = vld [vmem:[%s3940_s25 + $0x28] sm:$0xff]  ;;  %748 = vmatpush.bf16.msra.mxu0 %v3333_v1 }
  0x22   : > { %v532_v11 = vrot.slane %v514_v7, 7  ;;  %v534_v12 = vrot.slane %v515_v9, 7  ;;  %v535_v13 = vrot.slane %v516_v10, 7  ;;  %v517_v42 = vld [vmem:[%s3940_s25 + $0x30] sm:$0xff]  ;;  %v518_v43 = vld [vmem:[%s3940_s25 + $0x38] sm:$0xff]  ;;  %s3792_s25 = smov 64  }
  0x23   : > { %v3952_v15 = vsel %vm527_vm0, %v528_v5, %v529_v6  ;;  %v3955_v16 = vsel %vm527_vm0, 0.0, %v528_v5  ;;  %v556_v17 = vsel %vm527_vm0, %v529_v6, 0.0  ;;  %v3959_v18 = vsel %vm527_vm0, 0.0, %v531_v8 }
  0x24   : > { %v569_v19 = vrot.slane %v3955_v16, 1  ;;  %v570_v20 = vrot.slane %v3952_v15, 1  ;;  %v572_v21 = vrot.slane %v556_v17, 1  ;;  %v617_v22 = vrot.slane %v556_v17, 2  ;;  %v3331_v17 = vld [vmem:[%s5160_s1 + $0x10] sm:$0xff] }
  0x25   : > { %v614_v23 = vrot.slane %v3955_v16, 2  ;;  %v615_v24 = vrot.slane %v3952_v15, 2  ;;  %v3966_v25 = vsel %vm527_vm0, %v531_v8, %v532_v11  ;;  %v557_v26 = vsel %vm527_vm0, %v532_v11, 0.0  ;;  %749 = vmatpush.bf16.msra.mxu0 %v3332_v14 }
  0x26   : > { %v571_v27 = vsel %vm568_vm1, %v569_v19, %v570_v20  ;;  %v573_v28 = vsel %vm568_vm1, %v570_v20, %v572_v21  ;;  %v574_v29 = vrot.slane %v3959_v18, 1  ;;  %v575_v30 = vrot.slane %v3966_v25, 1  ;;  %v3330_v19 = vld [vmem:[%s5160_s1 + $0x8] sm:$0xff]  ;;  %v3329_v20 = vld [vmem:[%s5160_s1] sm:$0xff]  ;;  %s5067_s1 = sshll.u32 %s496_s26, 2 }
  0x27   : > { %v3452_v31 = vpack.i.bf16 %v573_v28, %v571_v27  ;;  %v616_v32 = vsel %vm613_vm2, %v614_v23, %v615_v24  ;;  %v577_v33 = vrot.slane %v557_v26, 1  ;;  %v618_v34 = vsel %vm613_vm2, %v615_v24, %v617_v22 }
  0x28   : > { %v576_v35 = vsel %vm568_vm1, %v574_v29, %v575_v30  ;;  %v622_v36 = vrot.slane %v557_v26, 2  ;;  %v619_v37 = vrot.slane %v3959_v18, 2  ;;  %v620_v39 = vrot.slane %v3966_v25, 2 }
  0x29   : > { %3453 = vrot.lane.b32.xlu0 %v3452_v31, %s5148_s17  ;;  %v578_v38 = vsel %vm568_vm1, %v575_v30, %v577_v33  ;;  %v3981_v40 = vsel %vm527_vm0, %v534_v12, %v535_v13  ;;  %v3984_v41 = vsel %vm527_vm0, 0.0, %v534_v12  ;;  %v558_v45 = vsel %vm527_vm0, %v535_v13, 0.0  ;;  %750 = vmatpush.bf16.msra.mxu0 %v3331_v17 }
  0x2a   : > { %v3462_v44 = vpack.i.bf16 %v578_v38, %v576_v35  ;;  %v579_v46 = vrot.slane %v3984_v41, 1  ;;  %v580_v47 = vrot.slane %v3981_v40, 1  ;;  %v3457_v48 = vpack.i.bf16 %v618_v34, %v616_v32 }
  0x2b   : > { %v621_v49 = vsel %vm613_vm2, %v619_v37, %v620_v39  ;;  %v582_v50 = vrot.slane %v558_v45, 1  ;;  %v623_v51 = vsel %vm613_vm2, %v620_v39, %v622_v36  ;;  %v537_v53 = vrot.slane %v517_v42, 7 }
  0x2c   : > { %3463 = vrot.lane.b32.xlu1 %v3462_v44, %s5148_s17  ;;  %v581_v52 = vsel %vm568_vm1, %v579_v46, %v580_v47  ;;  %v538_v54 = vrot.slane %v518_v43, 7  ;;  %v627_v56 = vrot.slane %v558_v45, 2  ;;  %v624_v57 = vrot.slane %v3984_v41, 2 }
  0x2d   : > { %v583_v55 = vsel %vm568_vm1, %v580_v47, %v582_v50  ;;  %v625_v58 = vrot.slane %v3981_v40, 2  ;;  %v4002_v61 = vsel %vm527_vm0, 0.0, %v537_v53  ;;  %v3467_v2 = vpack.i.bf16 %v623_v51, %v621_v49  ;;  %751 = vmatpush.bf16.msra.mxu0 %v3330_v19 }
  0x2e   : > { %v3472_v59 = vpack.i.bf16 %v583_v55, %v581_v52  ;;  %v3999_v60 = vsel %vm527_vm0, %v537_v53, %v538_v54  ;;  %v559_v62 = vsel %vm527_vm0, %v538_v54, 0.0  ;;  %v584_v63 = vrot.slane %v4002_v61, 1 }
  0x2f   : > { %v585_v0 = vrot.slane %v3999_v60, 1  ;;  %v587_v1 = vrot.slane %v559_v62, 1  ;;  %v629_v3 = vrot.slane %v4002_v61, 2  ;;  %v630_v4 = vrot.slane %v3999_v60, 2 }
  0x30   : > { %3473 = vrot.lane.b32.xlu2 %v3472_v59, %s5148_s17  ;;  %v632_v5 = vrot.slane %v559_v62, 2  ;;  %v626_v6 = vsel %vm613_vm2, %v624_v57, %v625_v58  ;;  %v628_v7 = vsel %vm613_vm2, %v625_v58, %v627_v56 }
  0x31   : > { %3458 = vrot.lane.b32.xlu0 %v3457_v48, %s3792_s25  ;;  %v586_v8 = vsel %vm568_vm1, %v584_v63, %v585_v0  ;;  %v588_v9 = vsel %vm568_vm1, %v585_v0, %v587_v1  ;;  %v3477_v10 = vpack.i.bf16 %v628_v7, %v626_v6  ;;  %v631_v12 = vsel %vm613_vm2, %v629_v3, %v630_v4  ;;  %v4061_v0 = vld [vmem:[%s5162_s2] ss:$0 sm:$0xff] }
  0x32   : > { %v3482_v11 = vpack.i.bf16 %v588_v9, %v586_v8  ;;  %v633_v13 = vsel %vm613_vm2, %v630_v4, %v632_v5  ;;  %752 = vmatpush.bf16.msra.mxu0 %v3329_v20 }
  0x33   : > { %v3487_v14 = vpack.i.bf16 %v633_v13, %v631_v12 }
  0x34   : > { %3468 = vrot.lane.b32.xlu1 %v3467_v2, %s3792_s25 }
  0x38   : > { %3478 = vrot.lane.b32.xlu2 %v3477_v10, %s3792_s25 }
  0x39   : > { %3483 = vrot.lane.b32.xlu0 %v3482_v11, %s5148_s17 }
  0x3c   : > { %3488 = vrot.lane.b32.xlu1 %v3487_v14, %s3792_s25 }
  0x9b   : > { %v3454_v21 = vpop.permute.xlu0 %3453 }
  0x9c   : > { %v3456_v22 = vunpack.i.h.bf16 %v3454_v21  ;;  %v3455_v23 = vunpack.i.l.bf16 %v3454_v21 }
  0x9e   : > { %v3464_v26 = vpop.permute.xlu1 %3463  ;;  %v660_v29 = vsel %vm658_vm3, %v3952_v15, %v3456_v22  ;;  %v659_v30 = vsel %vm658_vm3, %v3955_v16, %v3455_v23  ;;  %v3474_v16 = vpop.permute.xlu2 %3473 }
  0x9f   : > { %v3466_v34 = vunpack.i.h.bf16 %v3464_v26  ;;  %v3465_v35 = vunpack.i.l.bf16 %v3464_v26  ;;  %v3476_v45 = vunpack.i.h.bf16 %v3474_v16  ;;  %v3475_v46 = vunpack.i.l.bf16 %v3474_v16 }
  0xa1   : > { %v662_v39 = vsel %vm658_vm3, %v3966_v25, %v3466_v34  ;;  %v661_v15 = vsel %vm658_vm3, %v3959_v18, %v3465_v35  ;;  %v664_v50 = vsel %vm658_vm3, %v3981_v40, %v3476_v45  ;;  %v663_v25 = vsel %vm658_vm3, %v3984_v41, %v3475_v46 }
  0xa3   : > { %v3459_v24 = vpop.permute.xlu0 %3458 }
  0xa4   : > { %v3461_v27 = vunpack.i.h.bf16 %v3459_v24  ;;  %v3460_v28 = vunpack.i.l.bf16 %v3459_v24 }
  0xa6   : > { %v668_v31 = vsel %vm667_vm4, %v659_v30, %v3460_v28  ;;  %v669_v32 = vsel %vm667_vm4, %v660_v29, %v3461_v27  ;;  %v3469_v36 = vpop.permute.xlu1 %3468  ;;  %v3479_v47 = vpop.permute.xlu2 %3478 }
  0xa7   : > { %v676_v33 = vpack.c.bf16 %v669_v32, %v668_v31  ;;  %v3471_v37 = vunpack.i.h.bf16 %v3469_v36  ;;  %v3470_v38 = vunpack.i.l.bf16 %v3469_v36  ;;  %v3481_v48 = vunpack.i.h.bf16 %v3479_v47 }
  0xa8   : > { %v3480_v49 = vunpack.i.l.bf16 %v3479_v47 }
  0xa9   : > { %3039 = vmatmul.msk.bf16.vlgmr.msra.gmra.mxu0 %vm732_vm5, %v676_v33  ;;  %v670_v42 = vsel %vm667_vm4, %v661_v15, %v3470_v38  ;;  %v671_v43 = vsel %vm667_vm4, %v662_v39, %v3471_v37  ;;  %v673_v51 = vsel %vm667_vm4, %v664_v50, %v3481_v48 }
  0xaa   : > { %v677_v44 = vpack.c.bf16 %v671_v43, %v670_v42  ;;  %v672_v18 = vsel %vm667_vm4, %v663_v25, %v3480_v49 }
  0xab   : > { %v678_v52 = vpack.c.bf16 %v673_v51, %v672_v18  ;;  %v3484_v53 = vpop.permute.xlu0 %3483 }
  0xac   : > { %v3486_v54 = vunpack.i.h.bf16 %v3484_v53  ;;  %v3485_v55 = vunpack.i.l.bf16 %v3484_v53 }
  0xae   : > { %v3489_v56 = vpop.permute.xlu1 %3488  ;;  %v666_v59 = vsel %vm658_vm3, %v3999_v60, %v3486_v54  ;;  %v665_v40 = vsel %vm658_vm3, %v4002_v61, %v3485_v55 }
  0xaf   : > { %v3491_v57 = vunpack.i.h.bf16 %v3489_v56  ;;  %v3490_v58 = vunpack.i.l.bf16 %v3489_v56 }
  0xb1   : > { %v674_v41 = vsel %vm667_vm4, %v665_v40, %v3490_v58  ;;  %v675_v62 = vsel %vm667_vm4, %v666_v59, %v3491_v57 }
  0xb2   : > { %v679_v63 = vpack.c.bf16 %v675_v62, %v674_v41 }
  0xb9   : > { %3040 = vmatmul.msk.bf16.gmra.mxu0 %vm732_vm5, %v677_v44 }
  0xc9   : > { %3041 = vmatmul.msk.bf16.gmra.mxu0 %vm732_vm5, %v678_v52 }
  0xd9   : > { %3042 = vmatmul.msk.bf16.gmra.mxu0 %vm732_vm5, %v679_v63 }
 0x126   : > { %v754_v1 = vpop.f32.mrf.mxu0 }
 0x127   : > { %v755_v2 = vadd.f32 %v4061_v0, %v754_v1 }
 0x129   : > { %v4064_v3 = vmax.f32 %v755_v2, 0.0 }
 0x12b   : > { %v791_v60 = vrot.slane %v4064_v3, 5 }
 0x12d   : > { %v4071_v6 = vsel %vm790_vm6, 0.0, %v791_v60 }
 0x12e   : > { %v756_v61 = vpop.f32.mrf.mxu0  ;;  %v1038_v10 = vrot.slane %v4071_v6, 6  ;;  %v993_v11 = vrot.slane %v4071_v6, 5  ;;  %v831_v21 = vrot.slane %v4071_v6, 1  ;;  %v920_v38 = vrot.slane %v4071_v6, 3 }
 0x12f   : > { %v757_v4 = vadd.f32 %v4061_v0, %v756_v61  ;;  %v875_v15 = vrot.slane %v4071_v6, 2 }
 0x131   : > { %v4068_v5 = vmax.f32 %v757_v4, 0.0 }
 0x133   : > { %v792_v7 = vrot.slane %v4068_v5, 5 }
 0x135   : > { %v4075_v8 = vsel %vm790_vm6, %v791_v60, %v792_v7  ;;  %v4078_v9 = vsel %vm790_vm6, %v792_v7, 0.0 }
 0x136   : > { %v759_v12 = vpop.f32.mrf.mxu0  ;;  %v1039_v13 = vrot.slane %v4075_v8, 6  ;;  %v1041_v14 = vrot.slane %v4078_v9, 6  ;;  %v994_v17 = vrot.slane %v4075_v8, 5  ;;  %v996_v19 = vrot.slane %v4078_v9, 5 }
 0x137   : > { %v760_v20 = vadd.f32 %v4061_v0, %v759_v12  ;;  %v832_v22 = vrot.slane %v4075_v8, 1  ;;  %v834_v23 = vrot.slane %v4078_v9, 1  ;;  %v921_v32 = vrot.slane %v4075_v8, 3 }
 0x138   : > { %v1040_v24 = vsel %vm1037_vm7, %v1038_v10, %v1039_v13  ;;  %v1042_v26 = vsel %vm1037_vm7, %v1039_v13, %v1041_v14  ;;  %v995_v27 = vsel %vm790_vm6, %v993_v11, %v994_v17  ;;  %v997_v28 = vsel %vm790_vm6, %v994_v17, %v996_v19 }
 0x139   : > { %v3497_v29 = vpack.i.bf16 %v1042_v26, %v1040_v24  ;;  %v3492_v30 = vpack.i.bf16 %v997_v28, %v995_v27  ;;  %v833_v31 = vsel %vm568_vm1, %v831_v21, %v832_v22  ;;  %v4096_v33 = vmax.f32 %v760_v20, 0.0 }
 0x13a   : > { %v835_v34 = vsel %vm568_vm1, %v832_v22, %v834_v23  ;;  %v923_v35 = vrot.slane %v4078_v9, 3  ;;  %v876_v36 = vrot.slane %v4075_v8, 2  ;;  %v878_v39 = vrot.slane %v4078_v9, 2 }
 0x13b   : > { %3498 = vrot.lane.b32.xlu0 %v3497_v29, %s3792_s25  ;;  %3493 = vrot.lane.b32.xlu2 %v3492_v30, %s5148_s17  ;;  %v3502_v37 = vpack.i.bf16 %v835_v34, %v833_v31  ;;  %v922_v16 = vsel %vm919_vm8, %v920_v38, %v921_v32  ;;  %v794_v42 = vrot.slane %v4096_v33, 5 }
 0x13c   : > { %v924_v44 = vsel %vm919_vm8, %v921_v32, %v923_v35  ;;  %v877_v45 = vsel %vm613_vm2, %v875_v15, %v876_v36  ;;  %v879_v46 = vsel %vm613_vm2, %v876_v36, %v878_v39 }
 0x13d   : > { %3503 = vrot.lane.b32.xlu1 %v3502_v37, %s5148_s17  ;;  %v3512_v49 = vpack.i.bf16 %v924_v44, %v922_v16  ;;  %v3507_v50 = vpack.i.bf16 %v879_v46, %v877_v45  ;;  %v4116_v25 = vsel %vm790_vm6, 0.0, %v794_v42 }
 0x13e   : > { %v761_v43 = vpop.f32.mrf.mxu0  ;;  %v836_v53 = vrot.slane %v4116_v25, 1  ;;  %v1043_v54 = vrot.slane %v4116_v25, 6  ;;  %v998_v41 = vrot.slane %v4116_v25, 5  ;;  %v925_v19 = vrot.slane %v4116_v25, 3 }
 0x13f   : > { %v762_v47 = vadd.f32 %v4061_v0, %v761_v43  ;;  %v880_v27 = vrot.slane %v4116_v25, 2 }
 0x141   : > { %v4113_v48 = vmax.f32 %v762_v47, 0.0 }
 0x143   : > { %v795_v18 = vrot.slane %v4113_v48, 5  ;;  %3513 = vrot.lane.b32.xlu0 %v3512_v49, %s5146_s19  ;;  %3508 = vrot.lane.b32.xlu2 %v3507_v50, %s3792_s25 }
 0x145   : > { %v4122_v51 = vsel %vm790_vm6, %v794_v42, %v795_v18  ;;  %v4125_v52 = vsel %vm790_vm6, %v795_v18, 0.0 }
 0x146   : > { %v764_v55 = vpop.f32.mrf.mxu0  ;;  %v837_v56 = vrot.slane %v4122_v51, 1  ;;  %v839_v57 = vrot.slane %v4125_v52, 1  ;;  %v1044_v58 = vrot.slane %v4122_v51, 6  ;;  %v1046_v59 = vrot.slane %v4125_v52, 6 }
 0x147   : > { %v765_v40 = vadd.f32 %v4061_v0, %v764_v55  ;;  %v999_v62 = vrot.slane %v4122_v51, 5  ;;  %v1001_v63 = vrot.slane %v4125_v52, 5  ;;  %v926_v13 = vrot.slane %v4122_v51, 3 }
 0x148   : > { %v838_v1 = vsel %vm568_vm1, %v836_v53, %v837_v56  ;;  %v840_v2 = vsel %vm568_vm1, %v837_v56, %v839_v57  ;;  %v1045_v60 = vsel %vm1037_vm7, %v1043_v54, %v1044_v58  ;;  %v1047_v61 = vsel %vm1037_vm7, %v1044_v58, %v1046_v59 }
 0x149   : > { %v3527_v4 = vpack.i.bf16 %v840_v2, %v838_v1  ;;  %v3522_v7 = vpack.i.bf16 %v1047_v61, %v1045_v60  ;;  %v1000_v10 = vsel %vm790_vm6, %v998_v41, %v999_v62  ;;  %v4142_v11 = vmax.f32 %v765_v40, 0.0 }
 0x14a   : > { %v1002_v12 = vsel %vm790_vm6, %v999_v62, %v1001_v63  ;;  %v928_v14 = vrot.slane %v4125_v52, 3  ;;  %v881_v20 = vrot.slane %v4122_v51, 2  ;;  %v883_v21 = vrot.slane %v4125_v52, 2 }
 0x14b   : > { %3528 = vrot.lane.b32.xlu0 %v3527_v4, %s5148_s17  ;;  %3523 = vrot.lane.b32.xlu2 %v3522_v7, %s3792_s25  ;;  %v3517_v17 = vpack.i.bf16 %v1002_v12, %v1000_v10  ;;  %v797_v22 = vrot.slane %v4142_v11, 5  ;;  %v927_v24 = vsel %vm919_vm8, %v925_v19, %v926_v13 }
 0x14c   : > { %v929_v26 = vsel %vm919_vm8, %v926_v13, %v928_v14  ;;  %v882_v29 = vsel %vm613_vm2, %v880_v27, %v881_v20  ;;  %v884_v30 = vsel %vm613_vm2, %v881_v20, %v883_v21 }
 0x14d   : > { %3518 = vrot.lane.b32.xlu1 %v3517_v17, %s5148_s17  ;;  %v3537_v32 = vpack.i.bf16 %v929_v26, %v927_v24  ;;  %v4163_v34 = vsel %vm790_vm6, 0.0, %v797_v22  ;;  %v3532_v36 = vpack.i.bf16 %v884_v30, %v882_v29 }
 0x14e   : > { %v766_v23 = vpop.f32.mrf.mxu0  ;;  %v841_v39 = vrot.slane %v4163_v34, 1  ;;  %v930_v15 = vrot.slane %v4163_v34, 3  ;;  %v885_v47 = vrot.slane %v4163_v34, 2  ;;  %v1003_v1 = vrot.slane %v4163_v34, 5 }
 0x14f   : > { %v767_v28 = vadd.f32 %v4061_v0, %v766_v23  ;;  %v1048_v12 = vrot.slane %v4163_v34, 6 }
 0x151   : > { %v4160_v31 = vmax.f32 %v767_v28, 0.0 }
 0x153   : > { %v798_v35 = vrot.slane %v4160_v31, 5  ;;  %3538 = vrot.lane.b32.xlu2 %v3537_v32, %s5146_s19 }
 0x155   : > { %v4168_v37 = vsel %vm790_vm6, %v797_v22, %v798_v35  ;;  %v4171_v38 = vsel %vm790_vm6, %v798_v35, 0.0  ;;  %3533 = vrot.lane.b32.xlu1 %v3532_v36, %s3792_s25 }
 0x156   : > { %v769_v16 = vpop.f32.mrf.mxu0  ;;  %v842_v42 = vrot.slane %v4168_v37, 1  ;;  %v844_v43 = vrot.slane %v4171_v38, 1  ;;  %v931_v44 = vrot.slane %v4168_v37, 3  ;;  %v933_v45 = vrot.slane %v4171_v38, 3 }
 0x157   : > { %v770_v46 = vadd.f32 %v4061_v0, %v769_v16  ;;  %v886_v49 = vrot.slane %v4168_v37, 2  ;;  %v888_v50 = vrot.slane %v4171_v38, 2  ;;  %v1004_v41 = vrot.slane %v4168_v37, 5 }
 0x158   : > { %v843_v18 = vsel %vm568_vm1, %v841_v39, %v842_v42  ;;  %v845_v53 = vsel %vm568_vm1, %v842_v42, %v844_v43  ;;  %v932_v54 = vsel %vm919_vm8, %v930_v15, %v931_v44  ;;  %v934_v55 = vsel %vm919_vm8, %v931_v44, %v933_v45 }
 0x159   : > { %v3542_v56 = vpack.i.bf16 %v845_v53, %v843_v18  ;;  %v3552_v57 = vpack.i.bf16 %v934_v55, %v932_v54  ;;  %v887_v58 = vsel %vm613_vm2, %v885_v47, %v886_v49  ;;  %v4189_v59 = vmax.f32 %v770_v46, 0.0 }
 0x15a   : > { %v889_v40 = vsel %vm613_vm2, %v886_v49, %v888_v50  ;;  %v1006_v62 = vrot.slane %v4171_v38, 5  ;;  %v1049_v2 = vrot.slane %v4168_v37, 6  ;;  %v1051_v60 = vrot.slane %v4171_v38, 6 }
 0x15b   : > { %3543 = vrot.lane.b32.xlu0 %v3542_v56, %s5148_s17  ;;  %3553 = vrot.lane.b32.xlu2 %v3552_v57, %s5146_s19  ;;  %v3547_v63 = vpack.i.bf16 %v889_v40, %v887_v58  ;;  %v800_v61 = vrot.slane %v4189_v59, 5  ;;  %v1005_v7 = vsel %vm790_vm6, %v1003_v1, %v1004_v41  ;;  %v3342_v1 = vld [vmem:[%s5163_s3 + $0x38] sm:$0xff] }
 0x15c   : > { %v1007_v10 = vsel %vm790_vm6, %v1004_v41, %v1006_v62  ;;  %v1050_v14 = vsel %vm1037_vm7, %v1048_v12, %v1049_v2  ;;  %v1052_v17 = vsel %vm1037_vm7, %v1049_v2, %v1051_v60  ;;  %v3348_v2 = vld [vmem:[%s5163_s3 + $0x68] sm:$0xff]  ;;  %1258 = vmatpush.bf16.msra.mxu1 %v3342_v1  ;;  %3401 = vmatpush.bf16.msra.mxu3 %v3342_v1  ;;  %v3341_v60 = vld [vmem:[%s5163_s3 + $0x30] sm:$0xff] }
 0x15d   : > { %3548 = vrot.lane.b32.xlu1 %v3547_v63, %s3792_s25  ;;  %v3557_v20 = vpack.i.bf16 %v1007_v10, %v1005_v7  ;;  %v4210_v21 = vsel %vm790_vm6, 0.0, %v800_v61  ;;  %v3562_v23 = vpack.i.bf16 %v1052_v17, %v1050_v14  ;;  %1289 = vmatpush.bf16.msra.mxu2 %v3348_v2  ;;  %v3346_v7 = vld [vmem:[%s5163_s3 + $0x58] sm:$0xff]  ;;  %v3339_v10 = vld [vmem:[%s5163_s3 + $0x20] sm:$0xff]  ;;  %v3345_v12 = vld [vmem:[%s5163_s3 + $0x50] sm:$0xff] }
 0x15e   : > { %v771_v4 = vpop.f32.mrf.mxu0  ;;  %v890_v26 = vrot.slane %v4210_v21, 2  ;;  %v846_v27 = vrot.slane %v4210_v21, 1  ;;  %v935_v35 = vrot.slane %v4210_v21, 3  ;;  %v1053_v55 = vrot.slane %v4210_v21, 6  ;;  %v3344_v14 = vld [vmem:[%s5163_s3 + $0x48] sm:$0xff]  ;;  %v3337_v17 = vld [vmem:[%s5163_s3 + $0x10] sm:$0xff] }
 0x15f   : > { %v772_v13 = vadd.f32 %v4061_v0, %v771_v4  ;;  %v1008_v56 = vrot.slane %v4210_v21, 5  ;;  %v3340_v4 = vld [vmem:[%s5163_s3 + $0x28] sm:$0xff] }
 0x160   : > { %1259 = vmatpush.bf16.msra.mxu1 %v3341_v60  ;;  %3402 = vmatpush.bf16.msra.mxu3 %v3341_v60  ;;  %v970_v60 = vrot.slane %v4116_v25, 4 }
 0x161   : > { %v4207_v19 = vmax.f32 %v772_v13, 0.0  ;;  %v3338_v13 = vld [vmem:[%s5163_s3 + $0x18] sm:$0xff] }
 0x163   : > { %v801_v22 = vrot.slane %v4207_v19, 5  ;;  %3558 = vrot.lane.b32.xlu0 %v3557_v20, %s5148_s17  ;;  %v3343_v20 = vld [vmem:[%s5163_s3 + $0x40] sm:$0xff] }
 0x164   : > { %1260 = vmatpush.bf16.msra.mxu1 %v3340_v4  ;;  %3403 = vmatpush.bf16.msra.mxu3 %v3340_v4 }
 0x165   : > { %v4215_v24 = vsel %vm790_vm6, %v800_v61, %v801_v22  ;;  %v4218_v0 = vsel %vm790_vm6, %v801_v22, 0.0  ;;  %3563 = vrot.lane.b32.xlu1 %v3562_v23, %s3792_s25  ;;  %v3347_v61 = vld [vmem:[%s5163_s3 + $0x60] sm:$0xff]  ;;  %v3336_v22 = vld [vmem:[%s5163_s3 + $0x8] sm:$0xff] }
 0x166   : > { %v891_v28 = vrot.slane %v4215_v24, 2  ;;  %v893_v29 = vrot.slane %v4218_v0, 2  ;;  %v847_v30 = vrot.slane %v4215_v24, 1  ;;  %v849_v32 = vrot.slane %v4218_v0, 1  ;;  %1290 = vmatpush.bf16.msra.mxu2 %v3347_v61  ;;  %v3335_v23 = vld [vmem:[%s5163_s3] sm:$0xff]  ;;  %s3747_s3 = scalar_lea.hbm %s5142_s15, 8 }
 0x167   : > { %v936_v36 = vrot.slane %v4215_v24, 3  ;;  %v938_v39 = vrot.slane %v4218_v0, 3  ;;  %v1054_v50 = vrot.slane %v4215_v24, 6  ;;  %v1056_v18 = vrot.slane %v4218_v0, 6 }
 0x168   : > { %v892_v15 = vsel %vm613_vm2, %v890_v26, %v891_v28  ;;  %v894_v16 = vsel %vm613_vm2, %v891_v28, %v893_v29  ;;  %v848_v42 = vsel %vm568_vm1, %v846_v27, %v847_v30  ;;  %v850_v43 = vsel %vm568_vm1, %v847_v30, %v849_v32  ;;  %1261 = vmatpush.bf16.msra.mxu1 %v3339_v10 }
 0x169   : > { %v3572_v44 = vpack.i.bf16 %v894_v16, %v892_v15  ;;  %v3567_v45 = vpack.i.bf16 %v850_v43, %v848_v42  ;;  %v937_v46 = vsel %vm919_vm8, %v935_v35, %v936_v36  ;;  %v939_v47 = vsel %vm919_vm8, %v936_v36, %v938_v39  ;;  %3404 = vmatpush.bf16.msra.mxu3 %v3339_v10 }
 0x16a   : > { %v3577_v49 = vpack.i.bf16 %v939_v47, %v937_v46  ;;  %v1009_v53 = vrot.slane %v4215_v24, 5  ;;  %v1011_v54 = vrot.slane %v4218_v0, 5  ;;  %v1055_v57 = vsel %vm1037_vm7, %v1053_v55, %v1054_v50  ;;  %1291 = vmatpush.bf16.msra.mxu2 %v3346_v7 }
 0x16b   : > { %3573 = vrot.lane.b32.xlu0 %v3572_v44, %s3792_s25  ;;  %3568 = vrot.lane.b32.xlu2 %v3567_v45, %s5148_s17  ;;  %v1057_v58 = vsel %vm1037_vm7, %v1054_v50, %v1056_v18  ;;  %v968_v27 = vrot.slane %v4078_v9, 4  ;;  %v966_v28 = vrot.slane %v4075_v8, 4  ;;  %v965_v32 = vrot.slane %v4071_v6, 4 }
 0x16c   : > { %v1010_v40 = vsel %vm790_vm6, %v1008_v56, %v1009_v53  ;;  %v1012_v41 = vsel %vm790_vm6, %v1009_v53, %v1011_v54  ;;  %v3587_v62 = vpack.i.bf16 %v1057_v58, %v1055_v57  ;;  %1262 = vmatpush.bf16.msra.mxu1 %v3338_v13 }
 0x16d   : > { %3578 = vrot.lane.b32.xlu1 %v3577_v49, %s5146_s19  ;;  %v3582_v63 = vpack.i.bf16 %v1012_v41, %v1010_v40  ;;  %3405 = vmatpush.bf16.msra.mxu3 %v3338_v13  ;;  %v967_v36 = vsel %vm964_vm9, %v965_v32, %v966_v28  ;;  %v969_v39 = vsel %vm964_vm9, %v966_v28, %v968_v27 }
 0x16e   : > { %1292 = vmatpush.bf16.msra.mxu2 %v3345_v12 }
 0x170   : > { %1263 = vmatpush.bf16.msra.mxu1 %v3337_v17 }
 0x171   : > { %3406 = vmatpush.bf16.msra.mxu3 %v3337_v17 }
 0x172   : > { %1293 = vmatpush.bf16.msra.mxu2 %v3344_v14 }
 0x173   : > { %3588 = vrot.lane.b32.xlu0 %v3587_v62, %s3792_s25  ;;  %3583 = vrot.lane.b32.xlu2 %v3582_v63, %s5148_s17  ;;  %s2905_s17 = scalar_lea.sflag [#allocation4], %s496_s26 }
 0x174   : > { %1264 = vmatpush.bf16.msra.mxu1 %v3336_v22 }
 0x175   : > { %3407 = vmatpush.bf16.msra.mxu3 %v3336_v22 }
 0x176   : > { %1294 = vmatpush.bf16.msra.mxu2 %v3343_v20 }
 0x178   : > { %1265 = vmatpush.bf16.msra.mxu1 %v3335_v23 }
 0x179   : > { %3408 = vmatpush.bf16.msra.mxu3 %v3335_v23 }
 0x195   : > { %v3494_v26 = vpop.permute.xlu2 %3493 }
 0x196   : > { %v3496_v29 = vunpack.i.h.bf16 %v3494_v26  ;;  %v3495_v30 = vunpack.i.l.bf16 %v3494_v26 }
 0x198   : > { %v1106_v42 = vsel %vm658_vm3, %v967_v36, %v3495_v30  ;;  %v1107_v43 = vsel %vm658_vm3, %v969_v39, %v3496_v29 }
 0x19d   : > { %v3509_v9 = vpop.permute.xlu2 %3508 }
 0x19e   : > { %v3511_v54 = vunpack.i.h.bf16 %v3509_v9  ;;  %v3510_v55 = vunpack.i.l.bf16 %v3509_v9 }
 0x1a5   : > { %v3524_v2 = vpop.permute.xlu2 %3523 }
 0x1a6   : > { %v3526_v10 = vunpack.i.h.bf16 %v3524_v2  ;;  %v3525_v12 = vunpack.i.l.bf16 %v3524_v2 }
 0x1ad   : > { %v3499_v35 = vpop.permute.xlu0 %3498  ;;  %v3539_v26 = vpop.permute.xlu2 %3538 }
 0x1ae   : > { %v3501_v15 = vunpack.i.h.bf16 %v3499_v35  ;;  %v3500_v16 = vunpack.i.l.bf16 %v3499_v35  ;;  %v3541_v36 = vunpack.i.h.bf16 %v3539_v26  ;;  %v3540_v39 = vunpack.i.l.bf16 %v3539_v26 }
 0x1af   : > { %v3504_v44 = vpop.permute.xlu1 %3503 }
 0x1b0   : > { %v3506_v45 = vunpack.i.h.bf16 %v3504_v44  ;;  %v3505_v46 = vunpack.i.l.bf16 %v3504_v44  ;;  %v1114_v47 = vsel %vm667_vm4, %v1106_v42, %v3500_v16  ;;  %v1115_v49 = vsel %vm667_vm4, %v1107_v43, %v3501_v15 }
 0x1b1   : > { %v1123_v50 = vpack.c.bf16 %v1115_v49, %v1114_v47 }
 0x1b2   : > { %v1083_v18 = vsel %vm658_vm3, %v4075_v8, %v3506_v45  ;;  %v1082_v53 = vsel %vm658_vm3, %v4071_v6, %v3505_v46  ;;  %v971_v8 = vrot.slane %v4122_v51, 4  ;;  %v973_v6 = vrot.slane %v4125_v52, 4 }
 0x1b3   : > { %3099 = vmatmul.msk.bf16.vlgmr.msra.gmra.mxu2 %vm732_vm5, %v1123_v50  ;;  %v1090_v40 = vsel %vm667_vm4, %v1082_v53, %v3510_v55  ;;  %v1091_v41 = vsel %vm667_vm4, %v1083_v18, %v3511_v54 }
 0x1b4   : > { %v972_v13 = vsel %vm964_vm9, %v970_v60, %v971_v8  ;;  %v974_v14 = vsel %vm964_vm9, %v971_v8, %v973_v6 }
 0x1b5   : > { %v3514_v56 = vpop.permute.xlu0 %3513  ;;  %v3554_v47 = vpop.permute.xlu2 %3553 }
 0x1b6   : > { %v3516_v57 = vunpack.i.h.bf16 %v3514_v56  ;;  %v3515_v58 = vunpack.i.l.bf16 %v3514_v56  ;;  %v3556_v55 = vunpack.i.h.bf16 %v3554_v47  ;;  %v3555_v56 = vunpack.i.l.bf16 %v3554_v47 }
 0x1b8   : > { %v1098_v62 = vsel %vm732_vm5, %v1090_v40, %v3515_v58  ;;  %v1099_v63 = vsel %vm732_vm5, %v1091_v41, %v3516_v57  ;;  %v976_v57 = vrot.slane %v4168_v37, 4  ;;  %v978_v58 = vrot.slane %v4171_v38, 4 }
 0x1b9   : > { %v1122_v1 = vpack.c.bf16 %v1099_v63, %v1098_v62 }
 0x1bb   : > { %1266 = vmatmul.bf16.vlgmr.msra.gmra.mxu1 %v1122_v1  ;;  %v975_v1 = vrot.slane %v4163_v34, 4 }
 0x1bd   : > { %v3529_v17 = vpop.permute.xlu0 %3528 }
 0x1be   : > { %v3531_v28 = vunpack.i.h.bf16 %v3529_v17  ;;  %v3530_v29 = vunpack.i.l.bf16 %v3529_v17 }
 0x1bf   : > { %v3519_v61 = vpop.permute.xlu1 %3518 }
 0x1c0   : > { %v3521_v4 = vunpack.i.h.bf16 %v3519_v61  ;;  %v3520_v7 = vunpack.i.l.bf16 %v3519_v61  ;;  %v1085_v15 = vsel %vm658_vm3, %v4122_v51, %v3531_v28  ;;  %v1084_v16 = vsel %vm658_vm3, %v4116_v25, %v3530_v29 }
 0x1c2   : > { %v1109_v20 = vsel %vm658_vm3, %v974_v14, %v3521_v4  ;;  %v1108_v22 = vsel %vm658_vm3, %v972_v13, %v3520_v7  ;;  %v977_v4 = vsel %vm964_vm9, %v975_v1, %v976_v57 }
 0x1c3   : > { %v1116_v23 = vsel %vm667_vm4, %v1108_v22, %v3525_v12  ;;  %v1117_v52 = vsel %vm667_vm4, %v1109_v20, %v3526_v10 }
 0x1c4   : > { %v1125_v27 = vpack.c.bf16 %v1117_v52, %v1116_v23 }
 0x1c5   : > { %v3569_v6 = vpop.permute.xlu2 %3568 }
 0x1c6   : > { %3100 = vmatmul.msk.bf16.gmra.mxu2 %vm732_vm5, %v1125_v27  ;;  %v3571_v17 = vunpack.i.h.bf16 %v3569_v6  ;;  %v3570_v20 = vunpack.i.l.bf16 %v3569_v6 }
 0x1c7   : > { %v3534_v30 = vpop.permute.xlu1 %3533 }
 0x1c8   : > { %v3536_v32 = vunpack.i.h.bf16 %v3534_v30  ;;  %v3535_v35 = vunpack.i.l.bf16 %v3534_v30  ;;  %v1089_v27 = vsel %vm658_vm3, %v4215_v24, %v3571_v17  ;;  %v1088_v28 = vsel %vm658_vm3, %v4210_v21, %v3570_v20 }
 0x1ca   : > { %v1092_v42 = vsel %vm667_vm4, %v1084_v16, %v3535_v35  ;;  %v1093_v43 = vsel %vm667_vm4, %v1085_v15, %v3536_v32  ;;  %v981_v15 = vrot.slane %v4215_v24, 4  ;;  %v983_v16 = vrot.slane %v4218_v0, 4 }
 0x1cb   : > { %v1100_v44 = vsel %vm732_vm5, %v1092_v42, %v3540_v39  ;;  %v1101_v9 = vsel %vm732_vm5, %v1093_v43, %v3541_v36 }
 0x1cc   : > { %v1124_v45 = vpack.c.bf16 %v1101_v9, %v1100_v44 }
 0x1cd   : > { %v3544_v46 = vpop.permute.xlu0 %3543  ;;  %v3584_v30 = vpop.permute.xlu2 %3583 }
 0x1ce   : > { %1271 = vmatmul.bf16.gmra.mxu1 %v1124_v45  ;;  %v3546_v49 = vunpack.i.h.bf16 %v3544_v46  ;;  %v3545_v50 = vunpack.i.l.bf16 %v3544_v46  ;;  %v3586_v44 = vunpack.i.h.bf16 %v3584_v30  ;;  %v3585_v9 = vunpack.i.l.bf16 %v3584_v30 }
 0x1cf   : > { %v3549_v18 = vpop.permute.xlu1 %3548  ;;  %v980_v46 = vrot.slane %v4210_v21, 4  ;;  %v4368_v21 = vld [vmem:[%s5164_s4] ss:$0 sm:$0xff] }
 0x1d0   : > { %v1087_v51 = vsel %vm658_vm3, %v4168_v37, %v3546_v49  ;;  %v1086_v25 = vsel %vm658_vm3, %v4163_v34, %v3545_v50  ;;  %v3551_v53 = vunpack.i.h.bf16 %v3549_v18  ;;  %v3550_v54 = vunpack.i.l.bf16 %v3549_v18 }
 0x1d1   : > { %v979_v37 = vsel %vm964_vm9, %v976_v57, %v978_v58  ;;  %v982_v49 = vsel %vm964_vm9, %v980_v46, %v981_v15  ;;  %v984_v50 = vsel %vm964_vm9, %v981_v15, %v983_v16 }
 0x1d2   : > { %v1094_v40 = vsel %vm667_vm4, %v1086_v25, %v3550_v54  ;;  %v1095_v41 = vsel %vm667_vm4, %v1087_v51, %v3551_v53  ;;  %v1113_v24 = vsel %vm658_vm3, %v984_v50, %v3586_v44  ;;  %v1112_v0 = vsel %vm658_vm3, %v982_v49, %v3585_v9 }
 0x1d3   : > { %v1102_v62 = vsel %vm732_vm5, %v1094_v40, %v3555_v56  ;;  %v1103_v63 = vsel %vm732_vm5, %v1095_v41, %v3556_v55 }
 0x1d4   : > { %v1126_v8 = vpack.c.bf16 %v1103_v63, %v1102_v62 }
 0x1d5   : > { %v3559_v2 = vpop.permute.xlu0 %3558 }
 0x1d6   : > { %v3561_v60 = vunpack.i.h.bf16 %v3559_v2  ;;  %v3560_v61 = vunpack.i.l.bf16 %v3559_v2  ;;  %1276 = vmatmul.bf16.vlgmr.msra.gmra.mxu3 %v1126_v8 }
 0x1d7   : > { %v3564_v38 = vpop.permute.xlu1 %3563 }
 0x1d8   : > { %v1111_v7 = vsel %vm658_vm3, %v979_v37, %v3561_v60  ;;  %v1110_v10 = vsel %vm658_vm3, %v977_v4, %v3560_v61  ;;  %v3566_v12 = vunpack.i.h.bf16 %v3564_v38  ;;  %v3565_v13 = vunpack.i.l.bf16 %v3564_v38 }
 0x1da   : > { %v1118_v14 = vsel %vm667_vm4, %v1110_v10, %v3565_v13  ;;  %v1119_v34 = vsel %vm667_vm4, %v1111_v7, %v3566_v12 }
 0x1db   : > { %v1127_v22 = vpack.c.bf16 %v1119_v34, %v1118_v14 }
 0x1dd   : > { %3101 = vmatmul.msk.bf16.gmra.mxu2 %vm732_vm5, %v1127_v22  ;;  %v3574_v23 = vpop.permute.xlu0 %3573 }
 0x1de   : > { %v3576_v52 = vunpack.i.h.bf16 %v3574_v23  ;;  %v3575_v26 = vunpack.i.l.bf16 %v3574_v23 }
 0x1df   : > { %v3579_v29 = vpop.permute.xlu1 %3578 }
 0x1e0   : > { %v3581_v32 = vunpack.i.h.bf16 %v3579_v29  ;;  %v3580_v35 = vunpack.i.l.bf16 %v3579_v29  ;;  %v1096_v36 = vsel %vm667_vm4, %v1088_v28, %v3575_v26  ;;  %v1097_v39 = vsel %vm667_vm4, %v1089_v27, %v3576_v52 }
 0x1e2   : > { %v1104_v42 = vsel %vm732_vm5, %v1096_v36, %v3580_v35  ;;  %v1105_v43 = vsel %vm732_vm5, %v1097_v39, %v3581_v32 }
 0x1e3   : > { %v1128_v45 = vpack.c.bf16 %v1105_v43, %v1104_v42 }
 0x1e5   : > { %v3589_v47 = vpop.permute.xlu0 %3588 }
 0x1e6   : > { %v3591_v18 = vunpack.i.h.bf16 %v3589_v47  ;;  %v3590_v51 = vunpack.i.l.bf16 %v3589_v47  ;;  %1281 = vmatmul.bf16.gmra.mxu3 %v1128_v45 }
 0x1e8   : > { %v1120_v25 = vsel %vm667_vm4, %v1112_v0, %v3590_v51  ;;  %v1121_v53 = vsel %vm667_vm4, %v1113_v24, %v3591_v18 }
 0x1e9   : > { %v1129_v54 = vpack.c.bf16 %v1121_v53, %v1120_v25 }
 0x1ed   : > { %3102 = vmatmul.msk.bf16.gmra.mxu2 %vm732_vm5, %v1129_v54 }
 0x236   : > { %v1296_v55 = vpop.f32.mrf.mxu2 }
 0x238   : > { %v1267_v56 = vpop.f32.mrf.mxu1 }
 0x239   : > { %v1268_v57 = vadd.f32 %v4368_v21, %v1267_v56 }
 0x23b   : > { %v1297_v58 = vadd.f32 %v1296_v55, %v1268_v57 }
 0x23d   : > { %v1316_v40 = vmax.f32 %v1297_v58, 0.0 }
 0x23e   : > { %v1298_v62 = vpop.f32.mrf.mxu2 }
 0x23f   : > { %v1396_v1 = vrot.slane %v1316_v40, 5 }
 0x240   : > { %v1269_v41 = vpop.f32.mrf.mxu1 }
 0x241   : > { %v1270_v63 = vadd.f32 %v4368_v21, %v1269_v41  ;;  %v4373_v6 = vsel %vm790_vm6, 0.0, %v1396_v1 }
 0x242   : > { %v1480_v37 = vrot.slane %v4373_v6, 2  ;;  %v1436_v38 = vrot.slane %v4373_v6, 1 }
 0x243   : > { %v1299_v2 = vadd.f32 %v1298_v62, %v1270_v63 }
 0x245   : > { %v1317_v8 = vmax.f32 %v1299_v2, 0.0 }
 0x247   : > { %v1397_v60 = vrot.slane %v1317_v8, 5 }
 0x249   : > { %v4376_v61 = vsel %vm790_vm6, %v1396_v1, %v1397_v60  ;;  %v4379_v4 = vsel %vm790_vm6, %v1397_v60, 0.0  ;;  %v1301_v14 = vpop.f32.mrf.mxu2 }
 0x24a   : > { %v1481_v7 = vrot.slane %v4376_v61, 2  ;;  %v1483_v10 = vrot.slane %v4379_v4, 2  ;;  %v1437_v12 = vrot.slane %v4376_v61, 1  ;;  %v1439_v13 = vrot.slane %v4379_v4, 1 }
 0x24b   : > { %v1272_v34 = vpop.f32.mrf.mxu1 }
 0x24c   : > { %v1273_v17 = vadd.f32 %v4368_v21, %v1272_v34  ;;  %v1482_v20 = vsel %vm613_vm2, %v1480_v37, %v1481_v7  ;;  %v1484_v22 = vsel %vm613_vm2, %v1481_v7, %v1483_v10  ;;  %v1438_v23 = vsel %vm568_vm1, %v1436_v38, %v1437_v12  ;;  %v3364_v7 = vld [vmem:[%s5132_s5 + $0x78] sm:$0xff] }
 0x24d   : > { %v3597_v52 = vpack.i.bf16 %v1484_v22, %v1482_v20  ;;  %v1440_v26 = vsel %vm568_vm1, %v1437_v12, %v1439_v13  ;;  %2129 = vmatpush.bf16.msrb.mxu0 %v3364_v7 }
 0x24e   : > { %v1302_v27 = vadd.f32 %v1301_v14, %v1273_v17  ;;  %v3592_v28 = vpack.i.bf16 %v1440_v26, %v1438_v23 }
 0x24f   : > { %3598 = vrot.lane.b32.xlu2 %v3597_v52, %s3792_s25 }
 0x250   : > { %3593 = vrot.lane.b32.xlu1 %v3592_v28, %s5165_s22  ;;  %v1318_v29 = vmax.f32 %v1302_v27, 0.0 }
 0x251   : > { %v1303_v36 = vpop.f32.mrf.mxu2 }
 0x252   : > { %v1399_v35 = vrot.slane %v1318_v29, 5 }
 0x253   : > { %v1274_v30 = vpop.f32.mrf.mxu1 }
 0x254   : > { %v1275_v32 = vadd.f32 %v4368_v21, %v1274_v30  ;;  %v4396_v16 = vsel %vm790_vm6, 0.0, %v1399_v35 }
 0x255   : > { %v1441_v45 = vrot.slane %v4396_v16, 1  ;;  %v1485_v46 = vrot.slane %v4396_v16, 2 }
 0x256   : > { %v1304_v39 = vadd.f32 %v1303_v36, %v1275_v32 }
 0x258   : > { %v1319_v15 = vmax.f32 %v1304_v39, 0.0  ;;  %v1525_v39 = vrot.slane %v4376_v61, 3 }
 0x259   : > { %v1277_v43 = vpop.f32.mrf.mxu3 }
 0x25a   : > { %v1400_v42 = vrot.slane %v1319_v15, 5  ;;  %v1278_v51 = vadd.f32 %v4368_v21, %v1277_v43  ;;  %v1527_v15 = vrot.slane %v4379_v4, 3  ;;  %v3363_v43 = vld [vmem:[%s5132_s5 + $0x70] sm:$0xff] }
 0x25b   : > { %2130 = vmatpush.bf16.msrb.mxu0 %v3363_v43 }
 0x25c   : > { %v4399_v44 = vsel %vm790_vm6, %v1399_v35, %v1400_v42  ;;  %v4402_v9 = vsel %vm790_vm6, %v1400_v42, 0.0  ;;  %v1524_v42 = vrot.slane %v4373_v6, 3 }
 0x25d   : > { %v1442_v47 = vrot.slane %v4399_v44, 1  ;;  %v1444_v49 = vrot.slane %v4402_v9, 1  ;;  %v1486_v50 = vrot.slane %v4399_v44, 2  ;;  %v1488_v18 = vrot.slane %v4402_v9, 2 }
 0x25f   : > { %v1443_v24 = vsel %vm568_vm1, %v1441_v45, %v1442_v47  ;;  %v1445_v0 = vsel %vm568_vm1, %v1442_v47, %v1444_v49  ;;  %v1487_v25 = vsel %vm613_vm2, %v1485_v46, %v1486_v50  ;;  %v1489_v53 = vsel %vm613_vm2, %v1486_v50, %v1488_v18 }
 0x260   : > { %v1306_v54 = vpop.f32.mrf.mxu2  ;;  %v3602_v55 = vpack.i.bf16 %v1445_v0, %v1443_v24  ;;  %v3607_v56 = vpack.i.bf16 %v1489_v53, %v1487_v25  ;;  %v1526_v49 = vsel %vm919_vm8, %v1524_v42, %v1525_v39  ;;  %v1528_v50 = vsel %vm919_vm8, %v1525_v39, %v1527_v15 }
 0x261   : > { %v1307_v57 = vadd.f32 %v1306_v54, %v1278_v51  ;;  %v1279_v58 = vpop.f32.mrf.mxu3  ;;  %v1530_v51 = vrot.slane %v4399_v44, 3  ;;  %v1532_v24 = vrot.slane %v4402_v9, 3  ;;  %v3627_v25 = vpack.i.bf16 %v1528_v50, %v1526_v49 }
 0x262   : > { %3603 = vrot.lane.b32.xlu0 %v3602_v55, %s5165_s22  ;;  %3608 = vrot.lane.b32.xlu1 %v3607_v56, %s3792_s25  ;;  %v1280_v62 = vadd.f32 %v4368_v21, %v1279_v58  ;;  %v1529_v54 = vrot.slane %v4396_v16, 3  ;;  %v1646_v50 = vrot.slane %v4399_v44, 6 }
 0x263   : > { %v1320_v40 = vmax.f32 %v1307_v57, 0.0  ;;  %v1533_v56 = vsel %vm919_vm8, %v1530_v51, %v1532_v24  ;;  %v3362_v57 = vld [vmem:[%s5132_s5 + $0x68] sm:$0xff] }
 0x264   : > { %v1531_v55 = vsel %vm919_vm8, %v1529_v54, %v1530_v51  ;;  %2131 = vmatpush.bf16.msrb.mxu0 %v3362_v57  ;;  %v1602_v54 = vrot.slane %v4399_v44, 5  ;;  %v3360_v57 = vld [vmem:[%s5132_s5 + $0x58] sm:$0xff] }
 0x265   : > { %v1402_v41 = vrot.slane %v1320_v40, 5 }
 0x267   : > { %v4419_v8 = vsel %vm790_vm6, 0.0, %v1402_v41 }
 0x268   : > { %v1308_v63 = vpop.f32.mrf.mxu2  ;;  %v1490_v38 = vrot.slane %v4419_v8, 2  ;;  %v1446_v14 = vrot.slane %v4419_v8, 1 }
 0x269   : > { %v1309_v1 = vadd.f32 %v1308_v63, %v1280_v62  ;;  %v1282_v2 = vpop.f32.mrf.mxu3 }
 0x26a   : > { %v1283_v13 = vadd.f32 %v4368_v21, %v1282_v2 }
 0x26b   : > { %v1321_v60 = vmax.f32 %v1309_v1, 0.0 }
 0x26d   : > { %v1403_v37 = vrot.slane %v1321_v60, 5 }
 0x26f   : > { %v4426_v10 = vsel %vm790_vm6, %v1402_v41, %v1403_v37  ;;  %v4429_v12 = vsel %vm790_vm6, %v1403_v37, 0.0 }
 0x270   : > { %v1311_v34 = vpop.f32.mrf.mxu2  ;;  %v1491_v17 = vrot.slane %v4426_v10, 2  ;;  %v1493_v20 = vrot.slane %v4429_v12, 2  ;;  %v1447_v22 = vrot.slane %v4426_v10, 1  ;;  %v1449_v23 = vrot.slane %v4429_v12, 1 }
 0x271   : > { %v1312_v52 = vadd.f32 %v1311_v34, %v1283_v13  ;;  %v1284_v36 = vpop.f32.mrf.mxu3 }
 0x272   : > { %v1492_v26 = vsel %vm613_vm2, %v1490_v38, %v1491_v17  ;;  %v1494_v27 = vsel %vm613_vm2, %v1491_v17, %v1493_v20  ;;  %v1448_v28 = vsel %vm568_vm1, %v1446_v14, %v1447_v22  ;;  %v1450_v29 = vsel %vm568_vm1, %v1447_v22, %v1449_v23 }
 0x273   : > { %v3617_v30 = vpack.i.bf16 %v1494_v27, %v1492_v26  ;;  %v3612_v32 = vpack.i.bf16 %v1450_v29, %v1448_v28  ;;  %v1322_v35 = vmax.f32 %v1312_v52, 0.0  ;;  %v1285_v45 = vadd.f32 %v4368_v21, %v1284_v36 }
 0x274   : > { %v3647_v14 = vpack.i.bf16 %v1533_v56, %v1531_v55  ;;  %v1535_v20 = vrot.slane %v4426_v10, 3  ;;  %v1537_v22 = vrot.slane %v4429_v12, 3  ;;  %v1641_v23 = vrot.slane %v4376_v61, 6  ;;  %v3354_v56 = vld [vmem:[%s5132_s5 + $0x28] sm:$0xff] }
 0x275   : > { %3618 = vrot.lane.b32.xlu0 %v3617_v30, %s3792_s25  ;;  %3613 = vrot.lane.b32.xlu2 %v3612_v32, %s5165_s22  ;;  %v1405_v46 = vrot.slane %v1322_v35, 5  ;;  %v1643_v52 = vrot.slane %v4379_v4, 6  ;;  %v1597_v26 = vrot.slane %v4376_v61, 5  ;;  %v1599_v27 = vrot.slane %v4379_v4, 5  ;;  %v3356_v30 = vld [vmem:[%s5132_s5 + $0x38] sm:$0xff] }
 0x276   : > { %v1534_v28 = vrot.slane %v4419_v8, 3  ;;  %v1640_v29 = vrot.slane %v4373_v6, 6  ;;  %v1596_v32 = vrot.slane %v4373_v6, 5  ;;  %v1538_v36 = vsel %vm919_vm8, %v1535_v20, %v1537_v22  ;;  %2100 = vmatpush.bf16.msrb.mxu3 %v3356_v30  ;;  %v3351_v30 = vld [vmem:[%s5132_s5 + $0x10] sm:$0xff] }
 0x277   : > { %v4455_v53 = vsel %vm790_vm6, 0.0, %v1405_v46  ;;  %v1644_v15 = vsel %vm1037_vm7, %v1641_v23, %v1643_v52  ;;  %v1600_v43 = vsel %vm790_vm6, %v1597_v26, %v1599_v27  ;;  %v1609_v22 = vrot.slane %v4429_v12, 5  ;;  %v3352_v52 = vld [vmem:[%s5132_s5 + $0x18] sm:$0xff] }
 0x278   : > { %v1313_v47 = vpop.f32.mrf.mxu2  ;;  %v1495_v41 = vrot.slane %v4455_v53, 2  ;;  %v1451_v62 = vrot.slane %v4455_v53, 1  ;;  %v1536_v35 = vsel %vm919_vm8, %v1534_v28, %v1535_v20  ;;  %v1642_v39 = vsel %vm1037_vm7, %v1640_v29, %v1641_v23 }
 0x279   : > { %v1314_v18 = vadd.f32 %v1313_v47, %v1285_v45  ;;  %v1598_v42 = vsel %vm790_vm6, %v1596_v32, %v1597_v26  ;;  %v3355_v45 = vld [vmem:[%s5132_s5 + $0x30] sm:$0xff]  ;;  %v3662_v47 = vpack.i.bf16 %v1538_v36, %v1536_v35  ;;  %v3642_v49 = vpack.i.bf16 %v1644_v15, %v1642_v39 }
 0x27a   : > { %2101 = vmatpush.bf16.msrb.mxu3 %v3355_v45  ;;  %v1539_v55 = vrot.slane %v4455_v53, 3  ;;  %v1607_v20 = vrot.slane %v4426_v10, 5  ;;  %v1650_v23 = vrot.slane %v4419_v8, 6  ;;  %v3359_v26 = vld [vmem:[%s5132_s5 + $0x50] sm:$0xff]  ;;  %v1606_v27 = vrot.slane %v4419_v8, 5 }
 0x27b   : > { %v1323_v0 = vmax.f32 %v1314_v18, 0.0  ;;  %v3632_v18 = vpack.i.bf16 %v1600_v43, %v1598_v42 }
 0x27c   : > { %v1608_v32 = vsel %vm790_vm6, %v1606_v27, %v1607_v20  ;;  %v1610_v35 = vsel %vm790_vm6, %v1607_v20, %v1609_v22 }
 0x27d   : > { %v1406_v21 = vrot.slane %v1323_v0, 5  ;;  %3628 = vrot.lane.b32.xlu0 %v3627_v25, %s5166_s18  ;;  %v1648_v0 = vrot.slane %v4402_v9, 6  ;;  %v1645_v25 = vrot.slane %v4396_v16, 6  ;;  %v3667_v39 = vpack.i.bf16 %v1610_v35, %v1608_v32  ;;  %v3379_v32 = vld [vmem:[%s5132_s5 + $0xf0] sm:$0xff]  ;;  %v3384_v35 = vld [vmem:[%s5132_s5 + $0x118] sm:$0xff] }
 0x27e   : > { %2102 = vmatpush.bf16.msrb.mxu3 %v3354_v56  ;;  %v3372_v56 = vld [vmem:[%s5132_s5 + $0xb8] sm:$0xff] }
 0x27f   : > { %v4465_v58 = vsel %vm790_vm6, %v1405_v46, %v1406_v21  ;;  %v4468_v40 = vsel %vm790_vm6, %v1406_v21, 0.0  ;;  %v3361_v46 = vld [vmem:[%s5132_s5 + $0x60] sm:$0xff]  ;;  %v1604_v21 = vrot.slane %v4402_v9, 5  ;;  %2158 = vmatpush.bf16.msrb.mxu2 %v3372_v56 }
 0x280   : > { %v1496_v63 = vrot.slane %v4465_v58, 2  ;;  %v1498_v1 = vrot.slane %v4468_v40, 2  ;;  %v1452_v2 = vrot.slane %v4465_v58, 1  ;;  %v1454_v60 = vrot.slane %v4468_v40, 1  ;;  %2132 = vmatpush.bf16.msrb.mxu0 %v3361_v46 }
 0x281   : > { %v1540_v51 = vrot.slane %v4465_v58, 3  ;;  %v1542_v24 = vrot.slane %v4468_v40, 3  ;;  %v1656_v15 = vrot.slane %v4465_v58, 6  ;;  %v1658_v42 = vrot.slane %v4468_v40, 6 }
 0x282   : > { %v1497_v37 = vsel %vm613_vm2, %v1495_v41, %v1496_v63  ;;  %v1499_v38 = vsel %vm613_vm2, %v1496_v63, %v1498_v1  ;;  %v1453_v7 = vsel %vm568_vm1, %v1451_v62, %v1452_v2  ;;  %v1455_v13 = vsel %vm568_vm1, %v1452_v2, %v1454_v60  ;;  %v3353_v60 = vld [vmem:[%s5132_s5 + $0x20] sm:$0xff] }
 0x283   : > { %v3637_v34 = vpack.i.bf16 %v1499_v38, %v1497_v37  ;;  %v3622_v17 = vpack.i.bf16 %v1455_v13, %v1453_v7  ;;  %v1647_v41 = vsel %vm1037_vm7, %v1645_v25, %v1646_v50  ;;  %v1601_v62 = vrot.slane %v4396_v16, 5  ;;  %2103 = vmatpush.bf16.msrb.mxu3 %v3353_v60 }
 0x284   : > { %v1541_v63 = vsel %vm919_vm8, %v1539_v55, %v1540_v51  ;;  %v1543_v1 = vsel %vm919_vm8, %v1540_v51, %v1542_v24  ;;  %v1649_v2 = vsel %vm1037_vm7, %v1646_v50, %v1648_v0  ;;  %2133 = vmatpush.bf16.msrb.mxu0 %v3360_v57  ;;  %v1605_v38 = vsel %vm790_vm6, %v1602_v54, %v1604_v21  ;;  %v3357_v21 = vld [vmem:[%s5132_s5 + $0x40] sm:$0xff]  ;;  %v3388_v57 = vld [vmem:[%s5132_s5 + $0x138] sm:$0xff] }
 0x285   : > { %3648 = vrot.lane.b32.xlu0 %v3647_v14, %s5166_s18  ;;  %3638 = vrot.lane.b32.xlu2 %v3637_v34, %s3792_s25  ;;  %v1603_v37 = vsel %vm790_vm6, %v1601_v62, %v1602_v54  ;;  %v3677_v7 = vpack.i.bf16 %v1543_v1, %v1541_v63  ;;  %v3657_v13 = vpack.i.bf16 %v1649_v2, %v1647_v41  ;;  %v1651_v34 = vrot.slane %v4426_v10, 6  ;;  %v3349_v54 = vld [vmem:[%s5132_s5] sm:$0xff]  ;;  %v3371_v41 = vld [vmem:[%s5132_s5 + $0xb0] sm:$0xff] }
 0x286   : > { %3623 = vrot.lane.b32.xlu1 %v3622_v17, %s5165_s22  ;;  %v3652_v14 = vpack.i.bf16 %v1605_v38, %v1603_v37  ;;  %v1653_v17 = vrot.slane %v4429_v12, 6  ;;  %v1612_v43 = vrot.slane %v4465_v58, 5  ;;  %v1614_v45 = vrot.slane %v4468_v40, 5  ;;  %2159 = vmatpush.bf16.msrb.mxu2 %v3371_v41  ;;  %v3387_v62 = vld [vmem:[%s5132_s5 + $0x130] sm:$0xff]  ;;  %v3390_v63 = vld [vmem:[%s5132_s5 + $0x148] sm:$0xff]  ;;  %v3369_v37 = vld [vmem:[%s5132_s5 + $0xa0] sm:$0xff] }
 0x287   : > { %v1652_v28 = vsel %vm1037_vm7, %v1650_v23, %v1651_v34  ;;  %2104 = vmatpush.bf16.msrb.mxu3 %v3352_v52  ;;  %v1655_v46 = vrot.slane %v4455_v53, 6  ;;  %v1611_v50 = vrot.slane %v4455_v53, 5  ;;  %v1659_v51 = vsel %vm1037_vm7, %v1656_v15, %v1658_v42  ;;  %v3370_v1 = vld [vmem:[%s5132_s5 + $0xa8] sm:$0xff]  ;;  %v3385_v38 = vld [vmem:[%s5132_s5 + $0x120] sm:$0xff] }
 0x288   : > { %v1654_v29 = vsel %vm1037_vm7, %v1651_v34, %v1653_v17  ;;  %2134 = vmatpush.bf16.msrb.mxu0 %v3359_v26  ;;  %v1615_v0 = vsel %vm790_vm6, %v1612_v43, %v1614_v45  ;;  %v3386_v2 = vld [vmem:[%s5132_s5 + $0x128] sm:$0xff]  ;;  %v3377_v42 = vld [vmem:[%s5132_s5 + $0xe0] sm:$0xff] }
 0x289   : > { %v3672_v36 = vpack.i.bf16 %v1654_v29, %v1652_v28  ;;  %v1613_v24 = vsel %vm790_vm6, %v1611_v50, %v1612_v43 }
 0x28a   : > { %v3682_v55 = vpack.i.bf16 %v1615_v0, %v1613_v24  ;;  %2160 = vmatpush.bf16.msrb.mxu2 %v3370_v1  ;;  %v3376_v24 = vld [vmem:[%s5132_s5 + $0xd8] sm:$0xff] }
 0x28b   : > { %2105 = vmatpush.bf16.msrb.mxu3 %v3351_v30  ;;  %v3367_v30 = vld [vmem:[%s5132_s5 + $0x90] sm:$0xff] }
 0x28d   : > { %3663 = vrot.lane.b32.xlu0 %v3662_v47, %s5166_s18  ;;  %3643 = vrot.lane.b32.xlu2 %v3642_v49, %s3792_s25  ;;  %v3350_v47 = vld [vmem:[%s5132_s5 + $0x8] sm:$0xff] }
 0x28e   : > { %3633 = vrot.lane.b32.xlu1 %v3632_v18, %s5165_s22  ;;  %v3358_v49 = vld [vmem:[%s5132_s5 + $0x48] sm:$0xff]  ;;  %v1657_v18 = vsel %vm1037_vm7, %v1655_v46, %v1656_v15  ;;  %2161 = vmatpush.bf16.msrb.mxu2 %v3369_v37  ;;  %v3365_v15 = vld [vmem:[%s5132_s5 + $0x80] sm:$0xff] }
 0x28f   : > { %2106 = vmatpush.bf16.msrb.mxu3 %v3350_v47  ;;  %2135 = vmatpush.bf16.msrb.mxu0 %v3358_v49  ;;  %v3687_v25 = vpack.i.bf16 %v1659_v51, %v1657_v18  ;;  %v3383_v18 = vld [vmem:[%s5132_s5 + $0x110] sm:$0xff]  ;;  %v3389_v51 = vld [vmem:[%s5132_s5 + $0x140] sm:$0xff] }
 0x290   : > { %v3373_v37 = vld [vmem:[%s5132_s5 + $0xc0] sm:$0xff] }
 0x293   : > { %2107 = vmatpush.bf16.msrb.mxu3 %v3349_v54  ;;  %2136 = vmatpush.bf16.msrb.mxu0 %v3357_v21 }
 0x295   : > { %3678 = vrot.lane.b32.xlu0 %v3677_v7, %s5166_s18  ;;  %3658 = vrot.lane.b32.xlu2 %v3657_v13, %s3792_s25  ;;  %v3380_v7 = vld [vmem:[%s5132_s5 + $0xf8] sm:$0xff] }
 0x296   : > { %3653 = vrot.lane.b32.xlu1 %v3652_v14, %s5165_s22  ;;  %v3368_v14 = vld [vmem:[%s5132_s5 + $0x98] sm:$0xff]  ;;  %2187 = vmatpush.bf16.msrb.mxu1 %v3380_v7 }
 0x297   : > { %2216 = vmatpush.bf16.msra.mxu3 %v3388_v57  ;;  %2251 = vmatpush.bf16.msra.mxu0 %v3390_v63  ;;  %v3375_v57 = vld [vmem:[%s5132_s5 + $0xd0] sm:$0xff]  ;;  %v3374_v63 = vld [vmem:[%s5132_s5 + $0xc8] sm:$0xff] }
 0x298   : > { %2162 = vmatpush.bf16.msrb.mxu2 %v3368_v14 }
 0x29a   : > { %2188 = vmatpush.bf16.msrb.mxu1 %v3379_v32 }
 0x29b   : > { %2217 = vmatpush.bf16.msra.mxu3 %v3387_v62  ;;  %2252 = vmatpush.bf16.msra.mxu0 %v3389_v51  ;;  %v3382_v62 = vld [vmem:[%s5132_s5 + $0x108] sm:$0xff] }
 0x29c   : > { %2163 = vmatpush.bf16.msrb.mxu2 %v3367_v30 }
 0x29d   : > { %1324 = vrot.lane.b32.xlu0 %v4064_v3, %s5166_s18  ;;  %3673 = vrot.lane.b32.xlu2 %v3672_v36, %s3792_s25  ;;  %v3366_v36 = vld [vmem:[%s5132_s5 + $0x88] sm:$0xff] }
 0x29e   : > { %3668 = vrot.lane.b32.xlu1 %v3667_v39, %s5165_s22  ;;  %v3378_v39 = vld [vmem:[%s5132_s5 + $0xe8] sm:$0xff] }
 0x29f   : > { %2218 = vmatpush.bf16.msra.mxu3 %v3386_v2  ;;  %2189 = vmatpush.bf16.msrb.mxu1 %v3378_v39 }
 0x2a0   : > { %2164 = vmatpush.bf16.msrb.mxu2 %v3366_v36 }
 0x2a3   : > { %2219 = vmatpush.bf16.msra.mxu3 %v3385_v38  ;;  %2190 = vmatpush.bf16.msrb.mxu1 %v3377_v42 }
 0x2a4   : > { %2165 = vmatpush.bf16.msrb.mxu2 %v3365_v15 }
 0x2a5   : > { %1350 = vrot.lane.b32.xlu0 %v4068_v5, %s3792_s25  ;;  %3688 = vrot.lane.b32.xlu2 %v3687_v25, %s3792_s25 }
 0x2a6   : > { %3683 = vrot.lane.b32.xlu1 %v3682_v55, %s5165_s22  ;;  %s2918_s22 = scalar_lea.hbm %s5142_s15, %s3927_s16 }
 0x2a7   : > { %2220 = vmatpush.bf16.msra.mxu3 %v3384_v35  ;;  %2191 = vmatpush.bf16.msrb.mxu1 %v3376_v24  ;;  %s2922_s19 = sshll.u32 %s2918_s22, 4  ;;  %s2923_s19 = int_to_ptr.hbm [resolvable:$true] %s2922_s19 }
 0x2a9   : > { %v4625_v60 = vpop.permute.xlu2 %3598 }
 0x2aa   : > { %v3600_v34 = vunpack.i.l.bf16 %v4625_v60  ;;  %v3601_v22 = vunpack.i.h.bf16 %v4625_v60 }
 0x2ab   : > { %2221 = vmatpush.bf16.msra.mxu3 %v3383_v18  ;;  %2192 = vmatpush.bf16.msrb.mxu1 %v3375_v57 }
 0x2ad   : > { %1352 = vrot.lane.b32.xlu0 %v4096_v33, %s3792_s25  ;;  %1348 = vrot.lane.b32.xlu2 %v4064_v3, %s3792_s25 }
 0x2ae   : > { %1326 = vrot.lane.b32.xlu1 %v4068_v5, %s5166_s18 }
 0x2af   : > { %2222 = vmatpush.bf16.msra.mxu3 %v3382_v62  ;;  %2193 = vmatpush.bf16.msrb.mxu1 %v3374_v63  ;;  %v1568_v62 = vrot.slane %v4373_v6, 4 }
 0x2b3   : > { %2194 = vmatpush.bf16.msrb.mxu1 %v3373_v37 }
 0x2b5   : > { %1334 = vrot.lane.b32.xlu0 %v4160_v31, %s5166_s18  ;;  %1330 = vrot.lane.b32.xlu2 %v4113_v48, %s5166_s18 }
 0x2b6   : > { %1328 = vrot.lane.b32.xlu1 %v4096_v33, %s5166_s18 }
 0x2bd   : > { %1336 = vrot.lane.b32.xlu0 %v4189_v59, %s5166_s18  ;;  %1332 = vrot.lane.b32.xlu2 %v4142_v11, %s5166_s18 }
 0x2be   : > { %1354 = vrot.lane.b32.xlu1 %v4113_v48, %s3792_s25 }
 0x2c2   : > { %v3594_v13 = vpop.permute.xlu1 %3593 }
 0x2c3   : > { %v3596_v17 = vunpack.i.h.bf16 %v3594_v13  ;;  %v3595_v20 = vunpack.i.l.bf16 %v3594_v13  ;;  %v3381_v13 = vld [vmem:[%s5132_s5 + $0x100] sm:$0xff] }
 0x2c4   : > { %2223 = vmatpush.bf16.msra.mxu3 %v3381_v13 }
 0x2c5   : > { %1362 = vrot.lane.b32.xlu0 %v4207_v19, %s3792_s25  ;;  %1358 = vrot.lane.b32.xlu2 %v4160_v31, %s3792_s25  ;;  %v1684_v23 = vsel %vm732_vm5, %v4373_v6, %v3595_v20  ;;  %v1685_v52 = vsel %vm732_vm5, %v4376_v61, %v3596_v17  ;;  %v1692_v26 = vsel %vm667_vm4, %v3595_v20, %v3600_v34 }
 0x2c6   : > { %1356 = vrot.lane.b32.xlu1 %v4142_v11, %s3792_s25  ;;  %v1724_v27 = vpack.c.bf16 %v1685_v52, %v1684_v23  ;;  %v1693_v28 = vsel %vm667_vm4, %v3596_v17, %v3601_v22 }
 0x2c7   : > { %v1725_v29 = vpack.c.bf16 %v1693_v28, %v1692_v26 }
 0x2c8   : > { %2108 = vmatmul.bf16.vlgmr.msrb.gmra.mxu3 %v1724_v27 }
 0x2c9   : > { %2137 = vmatmul.bf16.vlgmr.msrb.gmra.mxu0 %v1725_v29 }
 0x2cd   : > { %1360 = vrot.lane.b32.xlu2 %v4189_v59, %s3792_s25  ;;  %s3741_s25 = sshra.s32 %s2923_s19, 4  ;;  %s3742_s25 = int_to_ptr.hbm [resolvable:$true] %s3741_s25 }
 0x2ce   : > { %1338 = vrot.lane.b32.xlu1 %v4207_v19, %s5166_s18  ;;  %s498_s18 = scalar_lea.vmem [#allocation3], %s5067_s1  ;;  %s3743_s24 = scalar_lea.hbm %s3742_s25, 4 }
 0x2cf   : > { %v3614_v41 = vpop.permute.xlu2 %3613  ;;  %p3744_p11 = scmp.ne.s32.totalorder %s3742_s25, %s3743_s24  ;;  %p3748_p0 = scmp.lt.s32.totalorder %s3742_s25, %s5142_s15 }
 0x2d0   : > { %v3616_v1 = vunpack.i.h.bf16 %v3614_v41  ;;  %v3615_v2 = vunpack.i.l.bf16 %v3614_v41  ;;  %p3749_p1 = scmp.lt.s32.totalorder %s3747_s3, %s3743_s24 }
 0x2d1   : > { %p3745_p12 = pnand %p3744_p11, %p3916_p5 }
 0x2d2   : > { %v1688_v38 = vsel %vm732_vm5, %v4419_v8, %v3615_v2  ;;  %v1689_v7 = vsel %vm732_vm5, %v4426_v10, %v3616_v1  ;;  %p3750_p2 = por %p3749_p1, %p3748_p0 }
 0x2d3   : > { %v1736_v23 = vpack.c.bf16 %v1689_v7, %v1688_v38  ;;  %p3746_p13 = pneg %p3745_p12 }
 0x2d4   : > { %v3604_v43 = vpop.permute.xlu0 %3603  ;;  %v4682_v45 = vpop.permute.xlu1 %3608 }
 0x2d5   : > { %v3606_v46 = vunpack.i.h.bf16 %v3604_v43  ;;  %v3605_v47 = vunpack.i.l.bf16 %v3604_v43  ;;  %v3611_v49 = vunpack.i.h.bf16 %v4682_v45  ;;  %v3610_v50 = vunpack.i.l.bf16 %v4682_v45  ;;  %p3751_p3 = pnand %p3750_p2, %p3746_p13 }
 0x2d7   : > { %v1686_v0 = vsel %vm732_vm5, %v4396_v16, %v3605_v47  ;;  %v1687_v25 = vsel %vm732_vm5, %v4399_v44, %v3606_v46  ;;  %v1694_v54 = vsel %vm667_vm4, %v3605_v47, %v3610_v50  ;;  %v1695_v21 = vsel %vm667_vm4, %v3606_v46, %v3611_v49 }
 0x2d8   : > { %v1730_v55 = vpack.c.bf16 %v1687_v25, %v1686_v0  ;;  %v1731_v56 = vpack.c.bf16 %v1695_v21, %v1694_v54  ;;  %v1569_v21 = vrot.slane %v4376_v61, 4 }
 0x2da   : > { %2113 = vmatmul.bf16.gmra.mxu3 %v1730_v55  ;;  %2142 = vmatmul.bf16.gmra.mxu0 %v1731_v56  ;;  %v1571_v55 = vrot.slane %v4379_v4, 4 }
 0x2dc   : > { %v1572_v37 = vsel %vm964_vm9, %v1569_v21, %v1571_v55 }
 0x2df   : > { %v4740_v39 = vpop.permute.xlu2 %3638 }
 0x2e0   : > { %v3641_v42 = vunpack.i.h.bf16 %v4740_v39  ;;  %v3640_v43 = vunpack.i.l.bf16 %v4740_v39 }
 0x2e7   : > { %v4724_v14 = vpop.permute.xlu0 %3618  ;;  %v3644_v7 = vpop.permute.xlu2 %3643 }
 0x2e8   : > { %v3621_v17 = vunpack.i.h.bf16 %v4724_v14  ;;  %v3620_v20 = vunpack.i.l.bf16 %v4724_v14  ;;  %v3646_v45 = vunpack.i.h.bf16 %v3644_v7 }
 0x2ea   : > { %2118 = vmatmul.bf16.gmra.mxu3 %v1736_v23  ;;  %v1696_v52 = vsel %vm667_vm4, %v3615_v2, %v3620_v20  ;;  %v1697_v26 = vsel %vm667_vm4, %v3616_v1, %v3621_v17  ;;  %v1570_v2 = vsel %vm964_vm9, %v1568_v62, %v1569_v21 }
 0x2eb   : > { %v1737_v27 = vpack.c.bf16 %v1697_v26, %v1696_v52  ;;  %v1574_v26 = vrot.slane %v4399_v44, 4 }
 0x2ed   : > { %2147 = vmatmul.bf16.gmra.mxu0 %v1737_v27  ;;  %v1576_v27 = vrot.slane %v4402_v9, 4 }
 0x2ef   : > { %v3629_v28 = vpop.permute.xlu0 %3628 }
 0x2f0   : > { %v3631_v29 = vunpack.i.h.bf16 %v3629_v28  ;;  %v3630_v30 = vunpack.i.l.bf16 %v3629_v28 }
 0x2f2   : > { %v1700_v32 = vsel %vm658_vm3, %v3600_v34, %v3630_v30  ;;  %v1701_v35 = vsel %vm658_vm3, %v3601_v22, %v3631_v29 }
 0x2f3   : > { %v1726_v36 = vpack.c.bf16 %v1701_v35, %v1700_v32 }
 0x2f5   : > { %2166 = vmatmul.bf16.vlgmr.msrb.gmra.mxu2 %v1726_v36 }
 0x2f7   : > { %v3649_v46 = vpop.permute.xlu0 %3648 }
 0x2f8   : > { %v3624_v15 = vpop.permute.xlu1 %3623  ;;  %v3651_v24 = vunpack.i.h.bf16 %v3649_v46  ;;  %v3650_v0 = vunpack.i.l.bf16 %v3649_v46 }
 0x2f9   : > { %v3626_v47 = vunpack.i.h.bf16 %v3624_v15  ;;  %v3625_v18 = vunpack.i.l.bf16 %v3624_v15  ;;  %v1573_v15 = vrot.slane %v4396_v16, 4 }
 0x2fa   : > { %v1702_v57 = vsel %vm658_vm3, %v3610_v50, %v3650_v0  ;;  %v1703_v41 = vsel %vm658_vm3, %v3611_v49, %v3651_v24  ;;  %v3645_v50 = vunpack.i.l.bf16 %v3644_v7 }
 0x2fb   : > { %v1690_v51 = vsel %vm732_vm5, %v4455_v53, %v3625_v18  ;;  %v1691_v60 = vsel %vm732_vm5, %v4465_v58, %v3626_v47  ;;  %v1698_v34 = vsel %vm667_vm4, %v3625_v18, %v3640_v43  ;;  %v1699_v22 = vsel %vm667_vm4, %v3626_v47, %v3641_v42 }
 0x2fc   : > { %v1742_v25 = vpack.c.bf16 %v1691_v60, %v1690_v51  ;;  %v1743_v54 = vpack.c.bf16 %v1699_v22, %v1698_v34  ;;  %v1732_v61 = vpack.c.bf16 %v1703_v41, %v1702_v57  ;;  %v1729_v28 = vpack.c.bf16 %v3646_v45, %v3645_v50  ;;  %v3659_v34 = vpop.permute.xlu2 %3658 }
 0x2fd   : > { %v1575_v9 = vsel %vm964_vm9, %v1573_v15, %v1574_v26  ;;  %v1577_v47 = vsel %vm964_vm9, %v1574_v26, %v1576_v27  ;;  %v3661_v16 = vunpack.i.h.bf16 %v3659_v34  ;;  %v3660_v24 = vunpack.i.l.bf16 %v3659_v34  ;;  %v3395_v34 = vld [vmem:[%s5134_s7 + $0x20] sm:$0xff] }
 0x2fe   : > { %2123 = vmatmul.bf16.gmra.mxu3 %v1742_v25  ;;  %2152 = vmatmul.bf16.gmra.mxu0 %v1743_v54  ;;  %v1579_v25 = vrot.slane %v4426_v10, 4  ;;  %v1581_v54 = vrot.slane %v4429_v12, 4  ;;  %v1583_v26 = vrot.slane %v4455_v53, 4  ;;  %v3396_v53 = vld [vmem:[%s5134_s7 + $0x28] sm:$0xff] }
 0x2ff   : > { %v3664_v49 = vpop.permute.xlu0 %3663  ;;  %v1735_v21 = vpack.c.bf16 %v3661_v16, %v3660_v24  ;;  %2360 = vmatpush.bf16.msra.mxu2 %v3396_v53 }
 0x300   : > { %v3634_v56 = vpop.permute.xlu1 %3633  ;;  %v3666_v29 = vunpack.i.h.bf16 %v3664_v49  ;;  %v3665_v30 = vunpack.i.l.bf16 %v3664_v49  ;;  %v1584_v49 = vrot.slane %v4465_v58, 4 }
 0x301   : > { %v3636_v63 = vunpack.i.h.bf16 %v3634_v56  ;;  %v3635_v1 = vunpack.i.l.bf16 %v3634_v56 }
 0x302   : > { %v1704_v46 = vsel %vm658_vm3, %v3620_v20, %v3665_v30  ;;  %v1705_v44 = vsel %vm658_vm3, %v3621_v17, %v3666_v29  ;;  %v1585_v27 = vsel %vm964_vm9, %v1583_v26, %v1584_v49 }
 0x303   : > { %v1708_v4 = vsel %vm732_vm5, %v1570_v2, %v3635_v1  ;;  %v1709_v38 = vsel %vm732_vm5, %v1572_v37, %v3636_v63  ;;  %v1717_v6 = vsel %vm667_vm4, %v3636_v63, %v3646_v45  ;;  %v1716_v23 = vsel %vm667_vm4, %v3635_v1, %v3645_v50  ;;  %2361 = vmatpush.bf16.msra.mxu2 %v3395_v34 }
 0x304   : > { %v1727_v13 = vpack.c.bf16 %v1709_v38, %v1708_v4  ;;  %v1728_v32 = vpack.c.bf16 %v1717_v6, %v1716_v23  ;;  %v1738_v60 = vpack.c.bf16 %v1705_v44, %v1704_v46  ;;  %v1578_v63 = vrot.slane %v4419_v8, 4  ;;  %v3674_v38 = vpop.permute.xlu2 %3673 }
 0x305   : > { %2171 = vmatmul.bf16.gmra.mxu2 %v1732_v61  ;;  %v1582_v2 = vsel %vm964_vm9, %v1579_v25, %v1581_v54  ;;  %v3676_v8 = vunpack.i.h.bf16 %v3674_v38  ;;  %v1586_v6 = vrot.slane %v4468_v40, 4  ;;  %v3393_v54 = vld [vmem:[%s5134_s7 + $0x10] sm:$0xff] }
 0x306   : > { %2195 = vmatmul.bf16.vlgmr.msrb.gmra.mxu1 %v1727_v13  ;;  %v1580_v12 = vsel %vm964_vm9, %v1578_v63, %v1579_v25  ;;  %v3675_v13 = vunpack.i.l.bf16 %v3674_v38 }
 0x307   : > { %v3679_v20 = vpop.permute.xlu0 %3678 }
 0x308   : > { %v3654_v52 = vpop.permute.xlu1 %3653  ;;  %v3681_v55 = vunpack.i.h.bf16 %v3679_v20  ;;  %v3680_v56 = vunpack.i.l.bf16 %v3679_v20  ;;  %v1741_v45 = vpack.c.bf16 %v3676_v8, %v3675_v13  ;;  %v3394_v20 = vld [vmem:[%s5134_s7 + $0x18] sm:$0xff] }
 0x309   : > { %v3656_v35 = vunpack.i.h.bf16 %v3654_v52  ;;  %v3655_v36 = vunpack.i.l.bf16 %v3654_v52  ;;  %2362 = vmatpush.bf16.msra.mxu2 %v3394_v20 }
 0x30a   : > { %v1706_v1 = vsel %vm658_vm3, %v3640_v43, %v3680_v56  ;;  %v1707_v10 = vsel %vm658_vm3, %v3641_v42, %v3681_v55  ;;  %v3392_v56 = vld [vmem:[%s5134_s7 + $0x8] sm:$0xff] }
 0x30b   : > { %v1710_v18 = vsel %vm732_vm5, %v1575_v9, %v3655_v36  ;;  %v1711_v51 = vsel %vm732_vm5, %v1577_v47, %v3656_v35  ;;  %v1718_v14 = vsel %vm667_vm4, %v3655_v36, %v3660_v24  ;;  %v1719_v17 = vsel %vm667_vm4, %v3656_v35, %v3661_v16  ;;  %v4818_v47 = vld [vmem:[%s5133_s6] ss:$0 sm:$0xff] }
 0x30c   : > { %v1733_v22 = vpack.c.bf16 %v1711_v51, %v1710_v18  ;;  %v1734_v57 = vpack.c.bf16 %v1719_v17, %v1718_v14  ;;  %v1744_v4 = vpack.c.bf16 %v1707_v10, %v1706_v1 }
 0x30d   : > { %2363 = vmatpush.bf16.msra.mxu2 %v3393_v54 }
 0x30e   : > { %2224 = vmatmul.bf16.vlgmr.msra.gmra.mxu3 %v1728_v32  ;;  %3271 = vmatmul.msk.bf16.vlgmr.msra.gmra.mxu0 %vm658_vm3, %v1729_v28  ;;  %v1587_v28 = vsel %vm964_vm9, %v1584_v49, %v1586_v6  ;;  %v3689_v32 = vpop.permute.xlu2 %3688 }
 0x30f   : > { %v3691_v58 = vunpack.i.h.bf16 %v3689_v32  ;;  %v3690_v40 = vunpack.i.l.bf16 %v3689_v32 }
 0x310   : > { %v3669_v0 = vpop.permute.xlu1 %3668 }
 0x311   : > { %v3671_v41 = vunpack.i.h.bf16 %v3669_v0  ;;  %v3670_v62 = vunpack.i.l.bf16 %v3669_v0  ;;  %v1747_v46 = vpack.c.bf16 %v3691_v58, %v3690_v40  ;;  %2364 = vmatpush.bf16.msra.mxu2 %v3392_v56 }
 0x313   : > { %v1712_v37 = vsel %vm732_vm5, %v1580_v12, %v3670_v62  ;;  %v1713_v61 = vsel %vm732_vm5, %v1582_v2, %v3671_v41  ;;  %v1720_v43 = vsel %vm667_vm4, %v3670_v62, %v3675_v13  ;;  %v1721_v39 = vsel %vm667_vm4, %v3671_v41, %v3676_v8 }
 0x314   : > { %v1739_v7 = vpack.c.bf16 %v1713_v61, %v1712_v37  ;;  %v1740_v50 = vpack.c.bf16 %v1721_v39, %v1720_v43  ;;  %v3391_v61 = vld [vmem:[%s5134_s7] sm:$0xff] }
 0x315   : > { %2176 = vmatmul.bf16.gmra.mxu2 %v1738_v60 }
 0x316   : > { %2200 = vmatmul.bf16.gmra.mxu1 %v1733_v22  ;;  %2365 = vmatpush.bf16.msra.mxu2 %v3391_v61 }
 0x318   : > { %v3684_v42 = vpop.permute.xlu1 %3683 }
 0x319   : > { %v3686_v23 = vunpack.i.h.bf16 %v3684_v42  ;;  %v3685_v52 = vunpack.i.l.bf16 %v3684_v42 }
 0x31b   : > { %v1714_v29 = vsel %vm732_vm5, %v1585_v27, %v3685_v52  ;;  %v1715_v30 = vsel %vm732_vm5, %v1587_v28, %v3686_v23  ;;  %v1722_v36 = vsel %vm667_vm4, %v3685_v52, %v3690_v40  ;;  %v1723_v15 = vsel %vm667_vm4, %v3686_v23, %v3691_v58  ;;  %v1325_v23 = vpop.permute.xlu0 %1324 }
 0x31c   : > { %v1745_v35 = vpack.c.bf16 %v1715_v30, %v1714_v29  ;;  %v1746_v44 = vpack.c.bf16 %v1723_v15, %v1722_v36  ;;  %v1372_v58 = vsel %vm658_vm3, %v4064_v3, %v1325_v23  ;;  %v4860_v15 = vld [vmem:[%s5136_s9] ss:$0 sm:$0xff] }
 0x31e   : > { %2229 = vmatmul.bf16.gmra.mxu3 %v1734_v57  ;;  %3272 = vmatmul.msk.bf16.gmra.mxu0 %vm658_vm3, %v1735_v21 }
 0x320   : > { %v1327_v32 = vpop.permute.xlu1 %1326 }
 0x321   : > { %v1373_v53 = vsel %vm658_vm3, %v4068_v5, %v1327_v32 }
 0x323   : > { %v1351_v34 = vpop.permute.xlu0 %1350 }
 0x325   : > { %2181 = vmatmul.bf16.gmra.mxu2 %v1744_v4 }
 0x326   : > { %2205 = vmatmul.bf16.gmra.mxu1 %v1739_v7 }
 0x32e   : > { %2234 = vmatmul.bf16.gmra.mxu3 %v1740_v50  ;;  %3273 = vmatmul.msk.bf16.gmra.mxu0 %vm658_vm3, %v1741_v45  ;;  %v2397_v50 = vlaneseq }
 0x330   : > { %v2398_v26 = vshrl.u32 %v2397_v50, 7 }
 0x332   : > { %3692 = vset.pattern.permute.xlu1 %v2398_v26 }
 0x336   : > { %2210 = vmatmul.bf16.gmra.mxu1 %v1745_v35 }
 0x33a   : > { %2401 = vperm.xlu1 %3692, %v4860_v15  }
 0x33e   : > { %2239 = vmatmul.bf16.gmra.mxu3 %v1746_v44  ;;  %3274 = vmatmul.msk.bf16.gmra.mxu0 %vm658_vm3, %v1747_v46  ;;  %v1349_v44 = vpop.permute.xlu2 %1348 }
 0x346   : > { %v2138_v9 = vpop.f32.mrf.mxu0 }
 0x34b   : > { %v2109_v18 = vpop.f32.mrf.mxu3 }
 0x34c   : > { %v2110_v51 = vadd.f32 %v4818_v47, %v2109_v18  ;;  %v1380_v18 = vsel %vm667_vm4, %v1372_v58, %v1349_v44 }
 0x34e   : > { %v2140_v60 = vpop.f32.mrf.mxu0  ;;  %v2139_v22 = vadd.f32 %v2138_v9, %v2110_v51 }
 0x353   : > { %v2111_v16 = vpop.f32.mrf.mxu3 }
 0x354   : > { %v2112_v42 = vadd.f32 %v4818_v47, %v2111_v16  ;;  %v1381_v16 = vsel %vm667_vm4, %v1373_v53, %v1351_v34 }
 0x356   : > { %v2141_v29 = vadd.f32 %v2140_v60, %v2112_v42  ;;  %v1353_v42 = vpop.permute.xlu0 %1352 }
 0x357   : > { %v2143_v24 = vpop.f32.mrf.mxu0 }
 0x35d   : > { %v2114_v14 = vpop.f32.mrf.mxu3 }
 0x35e   : > { %v2115_v17 = vadd.f32 %v4818_v47, %v2114_v14  ;;  %v1329_v14 = vpop.permute.xlu1 %1328 }
 0x35f   : > { %v4828_v25 = vpop.f32.mrf.mxu0 }
 0x360   : > { %v2144_v0 = vadd.f32 %v2143_v24, %v2115_v17 }
 0x365   : > { %v2116_v21 = vpop.f32.mrf.mxu3 }
 0x366   : > { %v2117_v17 = vadd.f32 %v4818_v47, %v2116_v21 }
 0x36a   : > { %v2148_v55 = vpop.f32.mrf.mxu0 }
 0x36d   : > { %v2119_v57 = vpop.f32.mrf.mxu3 }
 0x36e   : > { %v2120_v41 = vadd.f32 %v4818_v47, %v2119_v57 }
 0x370   : > { %v4837_v62 = vadd.f32 %v2148_v55, %v2120_v41 }
 0x372   : > { %v4839_v63 = vpop.f32.mrf.mxu0 }
 0x375   : > { %v4841_v1 = vpop.f32.mrf.mxu3 }
 0x378   : > { %v2167_v12 = vpop.f32.mrf.mxu2 }
 0x379   : > { %v2168_v45 = vadd.f32 %v2167_v12, %v2139_v22  ;;  %v2146_v12 = vadd.f32 %v4828_v25, %v2117_v17 }
 0x37b   : > { %v2153_v10 = vpop.f32.mrf.mxu0 }
 0x380   : > { %v2169_v8 = vpop.f32.mrf.mxu2 }
 0x381   : > { %v2124_v2 = vpop.f32.mrf.mxu3  ;;  %v2170_v35 = vadd.f32 %v2169_v8, %v2141_v29  ;;  %v1331_v8 = vpop.permute.xlu2 %1330 }
 0x382   : > { %v2125_v37 = vadd.f32 %v4818_v47, %v2124_v2  ;;  %v1375_v25 = vsel %vm658_vm3, %v4113_v48, %v1331_v8 }
 0x383   : > { %v4847_v4 = vpop.f32.mrf.mxu0  ;;  %v2196_v38 = vpop.f32.mrf.mxu1 }
 0x384   : > { %v4849_v7 = vadd.f32 %v2153_v10, %v2125_v37  ;;  %v2197_v52 = vadd.f32 %v2196_v38, %v2168_v45  ;;  %v1355_v45 = vpop.permute.xlu1 %1354 }
 0x388   : > { %v2172_v49 = vpop.f32.mrf.mxu2 }
 0x389   : > { %v4851_v13 = vpop.f32.mrf.mxu3  ;;  %v2173_v54 = vadd.f32 %v2172_v49, %v2144_v0  ;;  %v1333_v44 = vpop.permute.xlu2 %1332 }
 0x38b   : > { %v2198_v43 = vpop.f32.mrf.mxu1  ;;  %v2254_v39 = vpop.f32.mrf.mxu0 }
 0x38c   : > { %v2199_v40 = vadd.f32 %v2198_v43, %v2170_v35  ;;  %v1374_v43 = vsel %vm658_vm3, %v4096_v33, %v1329_v14  ;;  %v2122_v33 = vadd.f32 %v4818_v47, %v4841_v1  ;;  %v3398_v1 = vld [vmem:[%s5138_s11 + $0x8] sm:$0xff]  ;;  %v1357_v34 = vpop.permute.xlu1 %1356 }
 0x38d   : > { %2497 = vmatpush.bf16.msra.mxu1 %v3398_v1 }
 0x390   : > { %v2174_v51 = vpop.f32.mrf.mxu2 }
 0x391   : > { %v2225_v6 = vpop.f32.mrf.mxu3  ;;  %v2175_v61 = vadd.f32 %v2174_v51, %v2146_v12 }
 0x392   : > { %v2226_v30 = vadd.f32 %v2225_v6, %v2197_v52  ;;  %v1382_v6 = vsel %vm667_vm4, %v1374_v43, %v1353_v42 }
 0x393   : > { %v2201_v27 = vpop.f32.mrf.mxu1  ;;  %v2256_v28 = vpop.f32.mrf.mxu0 }
 0x394   : > { %v2255_v36 = vadd.f32 %v2254_v39, %v2226_v30  ;;  %v2202_v57 = vadd.f32 %v2201_v27, %v2173_v54  ;;  %v1383_v27 = vsel %vm667_vm4, %v1375_v25, %v1355_v45  ;;  %v1339_v42 = vpop.permute.xlu1 %1338 }
 0x396   : > { %v2274_v22 = vadd.f32 %v2255_v36, %v1380_v18 }
 0x398   : > { %v2282_v55 = vmax.f32 %v2274_v22, 0.0  ;;  %v2177_v37 = vpop.f32.mrf.mxu2 }
 0x399   : > { %v2227_v46 = vpop.f32.mrf.mxu3  ;;  %v2178_v32 = vadd.f32 %v2177_v37, %v4837_v62  ;;  %v3397_v62 = vld [vmem:[%s5138_s11] sm:$0xff] }
 0x39a   : > { %v2228_v9 = vadd.f32 %v2227_v46, %v2199_v40  ;;  %v2405_v40 = vadd.s32 8, %v2398_v26  ;;  %v1335_v26 = vpop.permute.xlu0 %1334  ;;  %2498 = vmatpush.bf16.msra.mxu1 %v3397_v62 }
 0x39b   : > { %v2259_v60 = vpop.f32.mrf.mxu0  ;;  %v2203_v24 = vpop.f32.mrf.mxu1 }
 0x39c   : > { %v2257_v3 = vadd.f32 %v2256_v28, %v2228_v9  ;;  %v2204_v21 = vadd.f32 %v2203_v24, %v2175_v61  ;;  %3693 = vset.pattern.permute.xlu2 %v2405_v40  ;;  %v2151_v9 = vadd.f32 %v4839_v63, %v2122_v33  ;;  %v1376_v24 = vsel %vm658_vm3, %v4142_v11, %v1333_v44 }
 0x39d   : > { %v1384_v17 = vsel %vm667_vm4, %v1376_v24, %v1357_v34 }
 0x39e   : > { %v2275_v20 = vadd.f32 %v2257_v3, %v1381_v16 }
 0x3a0   : > { %v2283_v5 = vmax.f32 %v2275_v20, 0.0  ;;  %v2179_v30 = vpop.f32.mrf.mxu2  ;;  %v1377_v20 = vsel %vm658_vm3, %v4160_v31, %v1335_v26 }
 0x3a1   : > { %v2230_v56 = vpop.f32.mrf.mxu3  ;;  %v2180_v51 = vadd.f32 %v2179_v30, %v2151_v9 }
 0x3a2   : > { %v2290_v41 = vpack.c.bf16 %v2283_v5, %v2282_v55  ;;  %v2231_v2 = vadd.f32 %v2230_v56, %v2202_v57  ;;  %v1359_v55 = vpop.permute.xlu2 %1358 }
 0x3a3   : > { %v2261_v10 = vpop.f32.mrf.mxu0  ;;  %v2206_v38 = vpop.f32.mrf.mxu1  ;;  %v1385_v57 = vsel %vm667_vm4, %v1377_v20, %v1359_v55 }
 0x3a4   : > { %3299 = vmatmul.msk.bf16.vlgmr.msra.gmra.mxu2 %vm732_vm5, %v2290_v41  ;;  %v2260_v0 = vadd.f32 %v2259_v60, %v2231_v2  ;;  %v2207_v53 = vadd.f32 %v2206_v38, %v2178_v32  ;;  %2407 = vperm.xlu2 %3693, %v4860_v15   ;;  %v1337_v15 = vpop.permute.xlu0 %1336 }
 0x3a6   : > { %v2276_v23 = vadd.f32 %v2260_v0, %v1382_v6  ;;  %v1379_v6 = vsel %vm658_vm3, %v4207_v19, %v1339_v42  ;;  %v3701_v19 = vld [vmem:[%s5135_s8] ss:$0 sm:$0xff] }
 0x3a8   : > { %v2284_v35 = vmax.f32 %v2276_v23, 0.0  ;;  %v2182_v16 = vpop.f32.mrf.mxu2 }
 0x3a9   : > { %v2232_v39 = vpop.f32.mrf.mxu3  ;;  %v2183_v11 = vadd.f32 %v2182_v16, %v4849_v7 }
 0x3aa   : > { %v2233_v49 = vadd.f32 %v2232_v39, %v2204_v21 }
 0x3ab   : > { %v2264_v28 = vpop.f32.mrf.mxu0  ;;  %v2208_v36 = vpop.f32.mrf.mxu1 }
 0x3ac   : > { %v2262_v52 = vadd.f32 %v2261_v10, %v2233_v49  ;;  %v2209_v22 = vadd.f32 %v2208_v36, %v2180_v51  ;;  %v2127_v10 = vadd.f32 %v4818_v47, %v4851_v13  ;;  %v1378_v47 = vsel %vm658_vm3, %v4189_v59, %v1337_v15  ;;  %v1361_v49 = vpop.permute.xlu2 %1360 }
 0x3ad   : > { %v1386_v23 = vsel %vm667_vm4, %v1378_v47, %v1361_v49  ;;  %v2454_v49 = vstv %s2453_s0  ;;  %s2920_s0 = sshll.u32 %s498_s18, 4  ;;  %s2921_s0 = int_to_ptr.vmem [resolvable:$true] %s2920_s0 }
 0x3ae   : > { %v2277_v29 = vadd.f32 %v2262_v52, %v1383_v27  ;;  %v2156_v43 = vadd.f32 %v4847_v4, %v2127_v10  ;;  %v1363_v52 = vpop.permute.xlu0 %1362 }
 0x3b0   : > { %v2285_v58 = vmax.f32 %v2277_v29, 0.0  ;;  %v2184_v8 = vpop.f32.mrf.mxu2  ;;  %v1387_v29 = vsel %vm667_vm4, %v1379_v6, %v1363_v52 }
 0x3b1   : > { %v2235_v46 = vpop.f32.mrf.mxu3  ;;  %v2185_v39 = vadd.f32 %v2184_v8, %v2156_v43 }
 0x3b2   : > { %v2291_v48 = vpack.c.bf16 %v2285_v58, %v2284_v35  ;;  %v2236_v18 = vadd.f32 %v2235_v46, %v2207_v53 }
 0x3b3   : > { %v2266_v60 = vpop.f32.mrf.mxu0  ;;  %v2211_v54 = vpop.f32.mrf.mxu1 }
 0x3b4   : > { %3300 = vmatmul.msk.bf16.gmra.mxu2 %vm732_vm5, %v2291_v48  ;;  %v2265_v3 = vadd.f32 %v2264_v28, %v2236_v18  ;;  %v2212_v61 = vadd.f32 %v2211_v54, %v2183_v11 }
 0x3b6   : > { %v2278_v5 = vadd.f32 %v2265_v3, %v1384_v17 }
 0x3b8   : > { %v2286_v12 = vmax.f32 %v2278_v5, 0.0 }
 0x3b9   : > { %v2237_v63 = vpop.f32.mrf.mxu3 }
 0x3ba   : > { %v2238_v14 = vadd.f32 %v2237_v63, %v2209_v22 }
 0x3bb   : > { %v2269_v2 = vpop.f32.mrf.mxu0  ;;  %v2213_v0 = vpop.f32.mrf.mxu1 }
 0x3bc   : > { %v2267_v56 = vadd.f32 %v2266_v60, %v2238_v14  ;;  %v2214_v7 = vadd.f32 %v2213_v0, %v2185_v39 }
 0x3be   : > { %v2279_v41 = vadd.f32 %v2267_v56, %v1385_v57 }
 0x3c0   : > { %v2287_v31 = vmax.f32 %v2279_v41, 0.0  ;;  %v2402_v41 = vpop.permute.xlu1 %2401 }
 0x3c1   : > { %v2240_v37 = vpop.f32.mrf.mxu3 }
 0x3c2   : > { %v2292_v38 = vpack.c.bf16 %v2287_v31, %v2286_v12  ;;  %v2241_v21 = vadd.f32 %v2240_v37, %v2212_v61 }
 0x3c3   : > { %v2271_v4 = vpop.f32.mrf.mxu0 }
 0x3c4   : > { %3301 = vmatmul.msk.bf16.gmra.mxu2 %vm732_vm5, %v2292_v38  ;;  %v2270_v13 = vadd.f32 %v2269_v2, %v2241_v21 }
 0x3c6   : > { %v2280_v27 = vadd.f32 %v2270_v13, %v1386_v23 }
 0x3c8   : > { %v2288_v30 = vmax.f32 %v2280_v27, 0.0 }
 0x3c9   : > { %v2242_v45 = vpop.f32.mrf.mxu3 }
 0x3ca   : > { %v2243_v25 = vadd.f32 %v2242_v45, %v2214_v7 }
 0x3cc   : > { %v2272_v28 = vadd.f32 %v2271_v4, %v2243_v25 }
 0x3ce   : > { %v2281_v33 = vadd.f32 %v2272_v28, %v1387_v29 }
 0x3d0   : > { %v2289_v32 = vmax.f32 %v2281_v33, 0.0 }
 0x3d2   : > { %v2293_v59 = vpack.c.bf16 %v2289_v32, %v2288_v30 }
 0x3d4   : > { %3302 = vmatmul.msk.bf16.gmra.mxu2 %vm732_vm5, %v2293_v59 }
 0x3fe   : > { %v2408_v57 = vpop.permute.xlu2 %2407 }
 0x427   : > { %v2367_v35 = vpop.f32.mrf.mxu2 }
 0x428   : > { %v2368_v58 = vadd.f32 %v3701_v19, %v2367_v35 }
 0x42a   : > { %v4909_v46 = vmax.f32 %v2368_v58, 0.0 }
 0x42c   : > { %v2409_v11 = vmul.f32 %v2402_v41, %v4909_v46 }
 0x42e   : > { %v2417_v31 = vsel %vm658_vm3, %v2409_v11, 0.0 }
 0x42f   : > { %v2369_v40 = vpop.f32.mrf.mxu2 }
 0x430   : > { %v2370_v36 = vadd.f32 %v3701_v19, %v2369_v40 }
 0x432   : > { %v4911_v44 = vmax.f32 %v2370_v36, 0.0 }
 0x434   : > { %v2459_v53 = vpack.c.bf16 %v4911_v44, %v4909_v46  ;;  %v2410_v10 = vmul.f32 %v2408_v57, %v4911_v44 }
 0x436   : > { %3311 = vmatmul.msk.bf16.vlgmr.msra.gmra.mxu1 %vm658_vm3, %v2459_v53  ;;  %v2418_v12 = vsel %vm658_vm3, %v2410_v10, 0.0 }
 0x437   : > { %v2372_v48 = vpop.f32.mrf.mxu2  ;;  %v2419_v2 = vadd.f32 %v2418_v12, %v2417_v31 }
 0x438   : > { %v2373_v9 = vadd.f32 %v3701_v19, %v2372_v48 }
 0x439   : > { %v2420_v37 = vrot.slane %v2419_v2, 4 }
 0x43a   : > { %v4916_v51 = vmax.f32 %v2373_v9, 0.0 }
 0x43b   : > { %v2421_v15 = vadd.f32 %v2420_v37, %v2419_v2 }
 0x43c   : > { %v2411_v38 = vmul.f32 %v2402_v41, %v4916_v51 }
 0x43d   : > { %v2422_v8 = vrot.slane %v2421_v15, 2 }
 0x43e   : > { %v2426_v21 = vsel %vm658_vm3, %v2411_v38, 0.0 }
 0x43f   : > { %v2374_v18 = vpop.f32.mrf.mxu2  ;;  %v2423_v39 = vadd.f32 %v2422_v8, %v2421_v15 }
 0x440   : > { %v2375_v1 = vadd.f32 %v3701_v19, %v2374_v18 }
 0x441   : > { %v2424_v42 = vrot.slane %v2423_v39, 1 }
 0x442   : > { %v4918_v62 = vmax.f32 %v2375_v1, 0.0 }
 0x443   : > { %v2425_v7 = vadd.f32 %v2424_v42, %v2423_v39 }
 0x444   : > { %v2460_v26 = vpack.c.bf16 %v4918_v62, %v4916_v51  ;;  %v2412_v61 = vmul.f32 %v2408_v57, %v4918_v62 }
 0x445   : > { %v2455_v25 = vadd.f32 %v2454_v49, %v2425_v7 }
 0x446   : > { %3312 = vmatmul.msk.bf16.gmra.mxu1 %vm658_vm3, %v2460_v26  ;;  %v2427_v43 = vsel %vm658_vm3, %v2412_v61, 0.0 }
 0x447   : > { %v2377_v60 = vpop.f32.mrf.mxu2  ;;  %v2428_v0 = vadd.f32 %v2427_v43, %v2426_v21 }
 0x448   : > { %v2378_v34 = vadd.f32 %v3701_v19, %v2377_v60 }
 0x449   : > { %v2429_v47 = vrot.slane %v2428_v0, 4 }
 0x44a   : > { %v4923_v16 = vmax.f32 %v2378_v34, 0.0 }
 0x44b   : > { %v2430_v13 = vadd.f32 %v2429_v47, %v2428_v0 }
 0x44c   : > { %v2413_v6 = vmul.f32 %v2402_v41, %v4923_v16 }
 0x44d   : > { %v2431_v23 = vrot.slane %v2430_v13, 2 }
 0x44e   : > { %v2435_v28 = vsel %vm658_vm3, %v2413_v6, 0.0 }
 0x44f   : > { %v2379_v22 = vpop.f32.mrf.mxu2  ;;  %v2432_v30 = vadd.f32 %v2431_v23, %v2430_v13 }
 0x450   : > { %v2380_v3 = vadd.f32 %v3701_v19, %v2379_v22 }
 0x451   : > { %v2433_v32 = vrot.slane %v2432_v30, 1 }
 0x452   : > { %v4925_v63 = vmax.f32 %v2380_v3, 0.0 }
 0x453   : > { %v2434_v40 = vadd.f32 %v2433_v32, %v2432_v30 }
 0x454   : > { %v2461_v24 = vpack.c.bf16 %v4925_v63, %v4923_v16  ;;  %v2414_v45 = vmul.f32 %v2408_v57, %v4925_v63 }
 0x455   : > { %v2456_v9 = vadd.f32 %v2454_v49, %v2434_v40 }
 0x456   : > { %3313 = vmatmul.msk.bf16.gmra.mxu1 %vm658_vm3, %v2461_v24  ;;  %v2436_v4 = vsel %vm658_vm3, %v2414_v45, 0.0 }
 0x457   : > { %v2382_v20 = vpop.f32.mrf.mxu2  ;;  %v2437_v29 = vadd.f32 %v2436_v4, %v2435_v28  ;;  %v4962_v4 = vand.u32 127, %v2397_v50 }
 0x458   : > { %v2383_v14 = vadd.f32 %v3701_v19, %v2382_v20 }
 0x459   : > { %v2438_v59 = vrot.slane %v2437_v29, 4 }
 0x45a   : > { %v4930_v55 = vmax.f32 %v2383_v14, 0.0 }
 0x45b   : > { %v2439_v36 = vadd.f32 %v2438_v59, %v2437_v29 }
 0x45c   : > { %v2415_v48 = vmul.f32 %v2402_v41, %v4930_v55 }
 0x45d   : > { %v2440_v18 = vrot.slane %v2439_v36, 2 }
 0x45e   : > { %v2444_v34 = vsel %vm658_vm3, %v2415_v48, 0.0 }
 0x45f   : > { %v2384_v17 = vpop.f32.mrf.mxu2  ;;  %v2441_v24 = vadd.f32 %v2440_v18, %v2439_v36 }
 0x460   : > { %v2385_v54 = vadd.f32 %v3701_v19, %v2384_v17 }
 0x461   : > { %v2442_v20 = vrot.slane %v2441_v24, 1 }
 0x462   : > { %v4932_v5 = vmax.f32 %v2385_v54, 0.0 }
 0x464   : > { %v2462_v56 = vpack.c.bf16 %v4932_v5, %v4930_v55  ;;  %v2416_v53 = vmul.f32 %v2408_v57, %v4932_v5  ;;  %v2443_v57 = vadd.f32 %v2442_v20, %v2441_v24 }
 0x466   : > { %3314 = vmatmul.msk.bf16.gmra.mxu1 %vm658_vm3, %v2462_v56  ;;  %v2445_v1 = vsel %vm658_vm3, %v2416_v53, 0.0  ;;  %v2457_v10 = vadd.f32 %v2454_v49, %v2443_v57 }
 0x467   : > { %v2446_v22 = vadd.f32 %v2445_v1, %v2444_v34 }
 0x469   : > { %v2447_v14 = vrot.slane %v2446_v22, 4 }
 0x46b   : > { %v2448_v41 = vadd.f32 %v2447_v14, %v2446_v22 }
 0x46d   : > { %v2449_v11 = vrot.slane %v2448_v41, 2 }
 0x46f   : > { %v2450_v37 = vadd.f32 %v2449_v11, %v2448_v41 }
 0x471   : > { %v2451_v15 = vrot.slane %v2450_v37, 1 }
 0x473   : > { %v2452_v43 = vadd.f32 %v2451_v15, %v2450_v37 }
 0x475   : > { %v2458_v21 = vadd.f32 %v2454_v49, %v2452_v43  ;;  %v4965_v49 = vadd.s32 4294967288, %v4962_v4 }
 0x4b3   : > { %v2500_v52 = vpop.f32.mrf.mxu1 }
 0x4b4   : > { %v2520_v27 = vmul.f32 %v2500_v52, %v2455_v25 }
 0x4b6   : > { %v2528_v33 = vsel %vm658_vm3, %v2520_v27, 0.0 }
 0x4b7   : > { %2529 = vadd.xlane.f32.xlu0 %v2528_v33 }
 0x4bb   : > { %v2502_v35 = vpop.f32.mrf.mxu1 }
 0x4bc   : > { %v2521_v19 = vmul.f32 %v2502_v35, %v2455_v25 }
 0x4be   : > { %v2531_v58 = vsel %vm658_vm3, %v2521_v19, 0.0 }
 0x4bf   : > { %2532 = vadd.xlane.f32.xlu1 %v2531_v58 }
 0x4c3   : > { %v2505_v26 = vpop.f32.mrf.mxu1 }
 0x4c4   : > { %v2522_v60 = vmul.f32 %v2505_v26, %v2456_v9 }
 0x4c6   : > { %v2534_v3 = vsel %vm658_vm3, %v2522_v60, 0.0  ;;  %v3794_v60 = vmov 0  }
 0x4c7   : > { %2535 = vadd.xlane.f32.xlu2 %v2534_v3  ;;  %3695 = vset.pattern.permute.xlu0 %v3794_v60 }
 0x4c8   : > { %3694 = vset.pattern.permute.xlu2 %v3794_v60  ;;  %3696 = vset.pattern.permute.xlu1 %v3794_v60 }
 0x4cb   : > { %v2507_v17 = vpop.f32.mrf.mxu1 }
 0x4cc   : > { %v2523_v54 = vmul.f32 %v2507_v17, %v2456_v9 }
 0x4ce   : > { %v2537_v56 = vsel %vm658_vm3, %v2523_v54, 0.0 }
 0x4cf   : > { %2538 = vadd.xlane.f32.xlu2 %v2537_v56 }
 0x4d3   : > { %v2510_v12 = vpop.f32.mrf.mxu1 }
 0x4d4   : > { %v2524_v31 = vmul.f32 %v2510_v12, %v2457_v10 }
 0x4d6   : > { %v2540_v2 = vsel %vm658_vm3, %v2524_v31, 0.0 }
 0x4d7   : > { %2541 = vadd.xlane.f32.xlu0 %v2540_v2 }
 0x4db   : > { %v2512_v61 = vpop.f32.mrf.mxu1 }
 0x4dc   : > { %v2525_v38 = vmul.f32 %v2512_v61, %v2457_v10 }
 0x4de   : > { %v2543_v8 = vsel %vm658_vm3, %v2525_v38, 0.0 }
 0x4df   : > { %2544 = vadd.xlane.f32.xlu1 %v2543_v8 }
 0x4e3   : > { %v2515_v0 = vpop.f32.mrf.mxu1 }
 0x4e4   : > { %v2526_v39 = vmul.f32 %v2515_v0, %v2458_v21 }
 0x4e6   : > { %v2546_v42 = vsel %vm658_vm3, %v2526_v39, 0.0 }
 0x4e7   : > { %2547 = vadd.xlane.f32.xlu2 %v2546_v42 }
 0x4eb   : > { %v2517_v47 = vpop.f32.mrf.mxu1 }
 0x4ec   : > { %v2527_v7 = vmul.f32 %v2517_v47, %v2458_v21 }
 0x4ee   : > { %v2549_v13 = vsel %vm658_vm3, %v2527_v7, 0.0 }
 0x4ef   : > { %2550 = vadd.xlane.f32.xlu0 %v2549_v13 }
 0x52a   : > { %v2530_v6 = vpop.xlane.xlu0 %2529 }
 0x52b   : > { %v2562_v50 = vperm.slane %v2530_v6, %v4962_v4 }
 0x532   : > { %v2533_v25 = vpop.xlane.xlu1 %2532 }
 0x533   : > { %v2564_v33 = vperm.slane %v2533_v25, %v4965_v49 }
 0x535   : > { %v2566_v40 = vsel %vm2565_vm10, %v2564_v33, %v2562_v50 }
 0x53a   : > { %v2536_v45 = vpop.xlane.xlu2 %2535 }
 0x53b   : > { %v2567_v30 = vperm.slane %v2536_v45, %v4962_v4 }
 0x542   : > { %v2539_v23 = vpop.xlane.xlu2 %2538 }
 0x543   : > { %v2568_v28 = vperm.slane %v2539_v23, %v4965_v49 }
 0x545   : > { %v2569_v35 = vsel %vm2565_vm10, %v2568_v28, %v2567_v30 }
 0x546   : > { %v2577_v48 = vsel %vm2576_vm11, %v2569_v35, %v2566_v40 }
 0x54a   : > { %v2542_v52 = vpop.xlane.xlu0 %2541 }
 0x54b   : > { %v2570_v32 = vperm.slane %v2542_v52, %v4962_v4 }
 0x552   : > { %v2545_v27 = vpop.xlane.xlu1 %2544 }
 0x553   : > { %v2571_v29 = vperm.slane %v2545_v27, %v4965_v49 }
 0x555   : > { %v2572_v58 = vsel %vm2565_vm10, %v2571_v29, %v2570_v32 }
 0x556   : > { %v2579_v18 = vsel %vm2578_vm12, %v2572_v58, %v2577_v48 }
 0x55a   : > { %v2548_v59 = vpop.xlane.xlu2 %2547 }
 0x55b   : > { %v2573_v36 = vperm.slane %v2548_v59, %v4962_v4 }
 0x562   : > { %v2551_v19 = vpop.xlane.xlu0 %2550 }
 0x563   : > { %v2574_v53 = vperm.slane %v2551_v19, %v4965_v49 }
 0x565   : > { %v2575_v9 = vsel %vm2565_vm10, %v2574_v53, %v2573_v36 }
 0x566   : > { %v2581_v1 = vsel %vm2580_vm13, %v2575_v9, %v2579_v18 }
 0x567   : > { %v2584_v26 = vsel %vm2583_vm14, %v2581_v1, -inf }
 0x568   : > { %2585 = vmax.xlane.f32.xlu1 %v2584_v26 }
 0x5db   : > { %v2586_v34 = vpop.xlane.xlu1 %2585 }
 0x5dc   : > { %v2588_v22 = vperm.slane %v2586_v34, 0  ;;  %v2589_v3 = vperm.slane %v2586_v34, 1  ;;  %v2590_v17 = vperm.slane %v2586_v34, 2  ;;  %v2591_v31 = vperm.slane %v2586_v34, 3 }
 0x5de   : > { %v2596_v24 = vsub.f32 %v2530_v6, %v2588_v22  ;;  %v2597_v20 = vsub.f32 %v2533_v25, %v2588_v22  ;;  %v2598_v14 = vsub.f32 %v2536_v45, %v2589_v3  ;;  %v2599_v41 = vsub.f32 %v2539_v23, %v2589_v3 }
 0x5df   : > { %v2600_v10 = vsub.f32 %v2542_v52, %v2590_v17  ;;  %v2601_v61 = vsub.f32 %v2545_v27, %v2590_v17  ;;  %v2602_v38 = vsub.f32 %v2548_v59, %v2591_v31  ;;  %v2603_v39 = vsub.f32 %v2551_v19, %v2591_v31 }
 0x5e0   : > { %v2604_v54 = vmul.f32 1.442695, %v2596_v24  ;;  %v2606_v56 = vmul.f32 1.442695, %v2597_v20  ;;  %v2608_v57 = vmul.f32 1.442695, %v2598_v14 }
 0x5e1   : > { %v2610_v11 = vmul.f32 1.442695, %v2599_v41  ;;  %v2612_v2 = vmul.f32 1.442695, %v2600_v10  ;;  %v2614_v8 = vmul.f32 1.442695, %v2601_v61 }
 0x5e2   : > { %3703 = vpow2.f32 %v2604_v54  ;;  %v2616_v21 = vmul.f32 1.442695, %v2602_v38  ;;  %v2618_v42 = vmul.f32 1.442695, %v2603_v39 }
 0x5e3   : > { %3705 = vpow2.f32 %v2606_v56 }
 0x5e4   : > { %3707 = vpow2.f32 %v2608_v57 }
 0x5e5   : > { %3709 = vpow2.f32 %v2610_v11 }
 0x5e6   : > { %3711 = vpow2.f32 %v2612_v2 }
 0x5e7   : > { %3713 = vpow2.f32 %v2614_v8 }
 0x5e8   : > { %v4983_v12 = vpop.eup %3703  ;;  %3715 = vpow2.f32 %v2616_v21 }
 0x5e9   : > { %v4985_v37 = vpop.eup %3705  ;;  %2629 = vperm.xlu2 %3694, %v4983_v12   ;;  %3717 = vpow2.f32 %v2618_v42 }
 0x5ea   : > { %v4988_v15 = vpop.eup %3707  ;;  %2632 = vperm.xlu0 %3695, %v4985_v37  }
 0x5eb   : > { %2635 = vperm.xlu1 %3696, %v4988_v15   ;;  %v4992_v43 = vpop.eup %3709 }
 0x5ec   : > { %v4995_v0 = vpop.eup %3711 }
 0x5ed   : > { %v4998_v47 = vpop.eup %3713 }
 0x5ee   : > { %v5001_v7 = vpop.eup %3715 }
 0x5ef   : > { %v5004_v13 = vpop.eup %3717 }
 0x5f1   : > { %2638 = vperm.xlu2 %3694, %v4992_v43  }
 0x5f3   : > { %2641 = vperm.xlu1 %3696, %v4995_v0  }
 0x5f9   : > { %2644 = vperm.xlu2 %3694, %v4998_v47  }
 0x5fb   : > { %2647 = vperm.xlu1 %3696, %v5001_v7  }
 0x601   : > { %2650 = vperm.xlu2 %3694, %v5004_v13  }
 0x643   : > { %v2630_v45 = vpop.permute.xlu2 %2629 }
 0x644   : > { %v2652_v30 = vperm.slane %v2630_v45, %v4962_v4 }
 0x64b   : > { %v2639_v6 = vpop.permute.xlu2 %2638 }
 0x64c   : > { %v2656_v32 = vperm.slane %v2639_v6, %v4965_v49 }
 0x653   : > { %v2645_v23 = vpop.permute.xlu2 %2644 }
 0x654   : > { %v2659_v59 = vperm.slane %v2645_v23, %v4965_v49 }
 0x65b   : > { %v2651_v50 = vpop.permute.xlu2 %2650 }
 0x65c   : > { %v2633_v52 = vpop.permute.xlu0 %2632  ;;  %v2662_v36 = vperm.slane %v2651_v50, %v4965_v49 }
 0x65d   : > { %v2636_v25 = vpop.permute.xlu1 %2635  ;;  %v2653_v29 = vperm.slane %v2633_v52, %v4965_v49 }
 0x65e   : > { %v2655_v28 = vperm.slane %v2636_v25, %v4962_v4 }
 0x65f   : > { %v2654_v19 = vsel %vm2565_vm10, %v2653_v29, %v2652_v30 }
 0x660   : > { %v2657_v35 = vsel %vm2565_vm10, %v2656_v32, %v2655_v28 }
 0x661   : > { %v2664_v48 = vsel %vm2576_vm11, %v2657_v35, %v2654_v19 }
 0x665   : > { %v2642_v27 = vpop.permute.xlu1 %2641 }
 0x666   : > { %v2658_v33 = vperm.slane %v2642_v27, %v4962_v4 }
 0x668   : > { %v2660_v58 = vsel %vm2565_vm10, %v2659_v59, %v2658_v33 }
 0x669   : > { %v2665_v18 = vsel %vm2578_vm12, %v2660_v58, %v2664_v48 }
 0x66d   : > { %v2648_v40 = vpop.permute.xlu1 %2647 }
 0x66e   : > { %v2661_v53 = vperm.slane %v2648_v40, %v4962_v4 }
 0x670   : > { %v2663_v9 = vsel %vm2565_vm10, %v2662_v36, %v2661_v53 }
 0x671   : > { %v2666_v1 = vsel %vm2580_vm13, %v2663_v9, %v2665_v18 }
 0x672   : > { %v2668_v26 = vsel %vm2583_vm14, %v2666_v1, 0.0 }
 0x673   : > { %2669 = vadd.xlane.f32.xlu0 %v2668_v26 }
 0x6e6   : > { %v2670_v60 = vpop.xlane.xlu0 %2669 }
 0x6e7   : > { %v2672_v34 = vperm.slane %v2670_v60, 0  ;;  %v2673_v22 = vperm.slane %v2670_v60, 1  ;;  %v2674_v3 = vperm.slane %v2670_v60, 2  ;;  %v5023_v20 = vperm.slane %v2670_v60, 3 }
 0x6e9   : > { %3719 = vrcp.f32 %v2672_v34  ;;  %v2689_v41 = vand.u32 2147483647, %v2672_v34  ;;  %v2691_v10 = vand.u32 2147483648, %v2672_v34  ;;  %vm2685_vm0 = vweird.f32 %v2672_v34 }
 0x6ea   : > { %3721 = vrcp.f32 %v2673_v22  ;;  %v2707_v25 = vand.u32 2147483648, %v2673_v22  ;;  %vm2701_vm5 = vweird.f32 %v2673_v22  ;;  %v2705_v27 = vand.u32 2147483647, %v2673_v22 }
 0x6eb   : > { %3723 = vrcp.f32 %v2674_v3  ;;  %vm2690_vm2 = vcmp.eq.f32.partialorder %v2689_v41, 8.507059e+37  ;;  %v2692_v8 = vor.u32 1.1754944e-38, %v2691_v10  ;;  %v2723_v35 = vand.u32 2147483648, %v2674_v3 }
 0x6ec   : > { %3725 = vrcp.f32 %v5023_v20  ;;  %v2708_v30 = vor.u32 1.1754944e-38, %v2707_v25  ;;  %vm2706_vm7 = vcmp.eq.f32.partialorder %v2705_v27, 8.507059e+37  ;;  %vm2717_vm9 = vweird.f32 %v2674_v3 }
 0x6ed   : > { %v2721_v19 = vand.u32 2147483647, %v2674_v3  ;;  %v2724_v36 = vor.u32 1.1754944e-38, %v2723_v35  ;;  %v2739_v9 = vand.u32 2147483648, %v5023_v20 }
 0x6ef   : > { %v3720_v24 = vpop.eup %3719  ;;  %v2740_v26 = vor.u32 1.1754944e-38, %v2739_v9 }
 0x6f0   : > { %v3722_v14 = vpop.eup %3721  ;;  %v2681_v17 = vmul.f32 %v3720_v24, %v2672_v34  ;;  %vm2686_vm15 = vweird.f32 %v3720_v24 }
 0x6f1   : > { %v3724_v54 = vpop.eup %3723  ;;  %v2697_v56 = vmul.f32 %v3722_v14, %v2673_v22  ;;  %vm2687_vm1 = vmor %vm2685_vm0, %vm2686_vm15  ;;  %vm2702_vm4 = vweird.f32 %v3722_v14  ;;  %vm2722_vm0 = vcmp.eq.f32.partialorder %v2721_v19, 8.507059e+37 }
 0x6f2   : > { %v2682_v57 = vsub.f32 1.0, %v2681_v17  ;;  %v2713_v31 = vmul.f32 %v3724_v54, %v2674_v3  ;;  %v3726_v45 = vpop.eup %3725  ;;  %vm2703_vm6 = vmor %vm2701_vm5, %vm2702_vm4  ;;  %vm2718_vm8 = vweird.f32 %v3724_v54 }
 0x6f3   : > { %v2698_v11 = vsub.f32 1.0, %v2697_v56  ;;  %v2729_v28 = vmul.f32 %v3726_v45, %v5023_v20  ;;  %vm2719_vm15 = vmor %vm2717_vm9, %vm2718_vm8 }
 0x6f4   : > { %v2683_v2 = vmul.f32 %v3720_v24, %v2682_v57  ;;  %v2714_v42 = vsub.f32 1.0, %v2713_v31 }
 0x6f5   : > { %v2699_v61 = vmul.f32 %v3722_v14, %v2698_v11  ;;  %v2730_v50 = vsub.f32 1.0, %v2729_v28 }
 0x6f6   : > { %v2684_v38 = vadd.f32 %v3720_v24, %v2683_v2  ;;  %v2715_v33 = vmul.f32 %v3724_v54, %v2714_v42 }
 0x6f7   : > { %v2700_v39 = vadd.f32 %v3722_v14, %v2699_v61  ;;  %v2731_v40 = vmul.f32 %v3726_v45, %v2730_v50 }
 0x6f8   : > { %v2688_v21 = vsel %vm2687_vm1, %v3720_v24, %v2684_v38  ;;  %v2716_v59 = vadd.f32 %v3724_v54, %v2715_v33  ;;  %vm2734_vm1 = vweird.f32 %v3726_v45 }
 0x6f9   : > { %v2693_v6 = vsel %vm2690_vm2, %v2692_v8, %v2688_v21  ;;  %v2704_v29 = vsel %vm2703_vm6, %v3722_v14, %v2700_v39  ;;  %v2732_v48 = vadd.f32 %v3726_v45, %v2731_v40  ;;  %vm2733_vm2 = vweird.f32 %v5023_v20  ;;  %v3399_v14 = vld [vmem:[%s5139_s12] sm:$0xff] }
 0x6fa   : > { %v2695_v23 = vmul.f32 %v4985_v37, %v2693_v6  ;;  %v2694_v52 = vmul.f32 %v4983_v12, %v2693_v6  ;;  %v2709_v32 = vsel %vm2706_vm7, %v2708_v30, %v2704_v29  ;;  %v2720_v58 = vsel %vm2719_vm15, %v3724_v54, %v2716_v59  ;;  %vm2735_vm4 = vmor %vm2733_vm2, %vm2734_vm1 }
 0x6fb   : > { %v2711_v37 = vmul.f32 %v4992_v43, %v2709_v32  ;;  %v2710_v12 = vmul.f32 %v4988_v15, %v2709_v32  ;;  %v2725_v53 = vsel %vm2722_vm0, %v2724_v36, %v2720_v58  ;;  %v2737_v15 = vand.u32 2147483647, %v5023_v20 }
 0x6fc   : > { %2751 = vperm.xlu2 %3694, %v2695_v23   ;;  %2746 = vperm.xlu1 %3696, %v2694_v52   ;;  %v2727_v18 = vmul.f32 %v4998_v47, %v2725_v53  ;;  %v2726_v43 = vmul.f32 %v4995_v0, %v2725_v53  ;;  %v2736_v1 = vsel %vm2735_vm4, %v3726_v45, %v2732_v48  ;;  %v3400_v0 = vld [vmem:[%s5139_s12 + $0x8] sm:$0xff] }
 0x6fd   : > { %vm2738_vm5 = vcmp.eq.f32.partialorder %v2737_v15, 8.507059e+37  ;;  %2873 = vmatpush.bf16.msrb.mxu3 %v3400_v0 }
 0x6fe   : > { %v2741_v60 = vsel %vm2738_vm5, %v2740_v26, %v2736_v1 }
 0x6ff   : > { %v2743_v34 = vmul.f32 %v5004_v13, %v2741_v60  ;;  %v2742_v22 = vmul.f32 %v5001_v7, %v2741_v60 }
 0x701   : > { %2874 = vmatpush.bf16.msrb.mxu3 %v3399_v14 }
 0x704   : > { %2761 = vperm.xlu2 %3694, %v2711_v37   ;;  %2756 = vperm.xlu1 %3696, %v2710_v12  }
 0x70c   : > { %2771 = vperm.xlu2 %3694, %v2727_v18   ;;  %2766 = vperm.xlu1 %3696, %v2726_v43  }
 0x714   : > { %2781 = vperm.xlu2 %3694, %v2743_v34   ;;  %2776 = vperm.xlu1 %3696, %v2742_v22  }
 0x756   : > { %v2752_v47 = vpop.permute.xlu2 %2751 }
 0x757   : > { %v2785_v13 = vmul.f32 %v2752_v47, %v4911_v44  ;;  %v2884_v29 = vperm.slane %v2752_v47, %v4965_v49 }
 0x759   : > { %v2793_v56 = vsel %vm658_vm3, %v2785_v13, 0.0 }
 0x75e   : > { %v2762_v3 = vpop.permute.xlu2 %2761 }
 0x75f   : > { %v2787_v7 = vmul.f32 %v2762_v3, %v4918_v62 }
 0x766   : > { %v2772_v41 = vpop.permute.xlu2 %2771 }
 0x767   : > { %v2789_v61 = vmul.f32 %v2772_v41, %v4925_v63  ;;  %v2887_v63 = vperm.slane %v2762_v3, %v4965_v49 }
 0x769   : > { %v2811_v39 = vsel %vm658_vm3, %v2789_v61, 0.0 }
 0x76e   : > { %v2747_v24 = vpop.permute.xlu1 %2746  ;;  %v2782_v45 = vpop.permute.xlu2 %2781 }
 0x76f   : > { %v2784_v20 = vmul.f32 %v2747_v24, %v4909_v46  ;;  %v2802_v46 = vsel %vm658_vm3, %v2787_v7, 0.0  ;;  %v2883_v52 = vperm.slane %v2747_v24, %v4962_v4  ;;  %v2791_v33 = vmul.f32 %v2782_v45, %v4932_v5 }
 0x770   : > { %v2893_v37 = vperm.slane %v2782_v45, %v4965_v49 }
 0x771   : > { %v2792_v17 = vsel %vm658_vm3, %v2784_v20, 0.0  ;;  %v2885_v12 = vsel %vm2565_vm10, %v2884_v29, %v2883_v52  ;;  %v2820_v53 = vsel %vm658_vm3, %v2791_v33, 0.0 }
 0x772   : > { %v2794_v10 = vadd.f32 %v2793_v56, %v2792_v17 }
 0x774   : > { %v2795_v2 = vrot.slane %v2794_v10, 4 }
 0x776   : > { %v2757_v54 = vpop.permute.xlu1 %2756  ;;  %v2796_v21 = vadd.f32 %v2795_v2, %v2794_v10 }
 0x777   : > { %v2786_v57 = vmul.f32 %v2757_v54, %v4916_v51  ;;  %v2886_v51 = vperm.slane %v2757_v54, %v4962_v4 }
 0x778   : > { %v2797_v27 = vrot.slane %v2796_v21, 2 }
 0x779   : > { %v2801_v11 = vsel %vm658_vm3, %v2786_v57, 0.0  ;;  %v2888_v30 = vsel %vm2565_vm10, %v2887_v63, %v2886_v51 }
 0x77a   : > { %v2803_v31 = vadd.f32 %v2802_v46, %v2801_v11  ;;  %v2798_v5 = vadd.f32 %v2797_v27, %v2796_v21  ;;  %v2895_v40 = vsel %vm2576_vm11, %v2888_v30, %v2885_v12 }
 0x77c   : > { %v2804_v44 = vrot.slane %v2803_v31, 4 }
 0x77e   : > { %v2805_v62 = vadd.f32 %v2804_v44, %v2803_v31  ;;  %v2767_v38 = vpop.permute.xlu1 %2766 }
 0x77f   : > { %v2788_v8 = vmul.f32 %v2767_v38, %v4923_v16  ;;  %v2889_v23 = vperm.slane %v2767_v38, %v4962_v4  ;;  %v2890_v16 = vperm.slane %v2772_v41, %v4965_v49 }
 0x780   : > { %v2806_v6 = vrot.slane %v2805_v62, 2 }
 0x781   : > { %v2810_v42 = vsel %vm658_vm3, %v2788_v8, 0.0  ;;  %v2891_v50 = vsel %vm2565_vm10, %v2890_v16, %v2889_v23 }
 0x782   : > { %v2812_v25 = vadd.f32 %v2811_v39, %v2810_v42  ;;  %v2807_v32 = vadd.f32 %v2806_v6, %v2805_v62  ;;  %v2896_v18 = vsel %vm2578_vm12, %v2891_v50, %v2895_v40 }
 0x784   : > { %v2813_v28 = vrot.slane %v2812_v25, 4  ;;  %v2808_v43 = vrot.slane %v2807_v32, 1 }
 0x786   : > { %v2814_v59 = vadd.f32 %v2813_v28, %v2812_v25  ;;  %v2777_v35 = vpop.permute.xlu1 %2776  ;;  %v2809_v60 = vadd.f32 %v2808_v43, %v2807_v32 }
 0x787   : > { %v2790_v19 = vmul.f32 %v2777_v35, %v4930_v55  ;;  %v2892_v58 = vperm.slane %v2777_v35, %v4962_v4  ;;  %v2799_v55 = vrot.slane %v2798_v5, 1 }
 0x788   : > { %v2815_v36 = vrot.slane %v2814_v59, 2  ;;  %v2829_v3 = vpack.c.bf16 %v2809_v60, %v2809_v60 }
 0x789   : > { %v2819_v48 = vsel %vm658_vm3, %v2790_v19, 0.0  ;;  %v2894_v9 = vsel %vm2565_vm10, %v2893_v37, %v2892_v58  ;;  %v2800_v0 = vadd.f32 %v2799_v55, %v2798_v5 }
 0x78a   : > { %v2816_v49 = vadd.f32 %v2815_v36, %v2814_v59  ;;  %v2821_v15 = vadd.f32 %v2820_v53, %v2819_v48  ;;  %v2897_v1 = vsel %vm2580_vm13, %v2894_v9, %v2896_v18  ;;  %v2845_v7 = vunpack.c.l.b16 %v2829_v3 }
 0x78b   : > { %2899 = vst.msk [vmem:[%s498_s18] sm:$0xf] %vm2583_vm14, %v2897_v1  ;;  %v2828_v14 = vpack.c.bf16 %v2800_v0, %v2800_v0 }
 0x78c   : > { %v2817_v4 = vrot.slane %v2816_v49, 1  ;;  %v2822_v26 = vrot.slane %v2821_v15, 4 }
 0x78d   : > { %v2844_v56 = vunpack.c.l.b16 %v2828_v14 }
 0x78e   : > { %v2823_v34 = vadd.f32 %v2822_v26, %v2821_v15  ;;  %v2818_v22 = vadd.f32 %v2817_v4, %v2816_v49 }
 0x78f   : > { %v2848_v41 = vsel %vm2576_vm11, %v2845_v7, %v2844_v56 }
 0x790   : > { %v2824_v47 = vrot.slane %v2823_v34, 2  ;;  %v2830_v20 = vpack.c.bf16 %v2818_v22, %v2818_v22 }
 0x792   : > { %v2825_v24 = vadd.f32 %v2824_v47, %v2823_v34  ;;  %v2846_v54 = vunpack.c.l.b16 %v2830_v20 }
 0x794   : > { %v2826_v13 = vrot.slane %v2825_v24, 1  ;;  %v2849_v46 = vsel %vm2578_vm12, %v2846_v54, %v2848_v41 }
 0x796   : > { %v2827_v17 = vadd.f32 %v2826_v13, %v2825_v24 }
 0x798   : > { %v2831_v57 = vpack.c.bf16 %v2827_v17, %v2827_v17 }
 0x79a   : > { %v2847_v10 = vunpack.c.l.b16 %v2831_v57 }
 0x79c   : > { %v2850_v11 = vsel %vm2580_vm13, %v2847_v10, %v2849_v46 }
 0x79d   : > { %v2851_v31 = vpack.c.b16 %v2850_v11, %v2850_v11 }
 0x79f   : > { %3323 = vmatmul.msk.bf16.vlgmr.msrb.gmra.mxu3 %vm658_vm3, %v2851_v31 }
 0x7a0   : > { %3754 = shalt.err (!%p3751_p3)
}
 0x7a1   : > { %3409 = dma.vmem_to_hbm [thread:$0]  (%p3916_p5), %s2921_s0, 64, %s2923_s19, %s2905_s17   ;;  %v3702_v2 = vld [vmem:[%s5140_s13] ss:$0 sm:$0xff]  ;;  %vm2881_vm3 = vcmask 27648  }
 0x7a2   : > { %p506_p4 = scmp.lt.s32.totalorder %s3899_s10, 1 }
 0x7a4   : > { %s5173_s10 = smov (!%p506_p4, %s3899_s10), 1 }
 0x7a5   : > { %s3014_s2 = sshll.u32 %s5173_s10, 2 }
 0x7a6   : > { %s509_s3 = scalar_lea.vmem %s5141_s14, %s3014_s2 }
 0x822   : > { %v2876_v44 = vpop.f32.mrf.mxu3 }
 0x823   : > { %v2877_v61 = vadd.f32 %v3702_v2, %v2876_v44 }
 0x825   : > { %v2880_v62 = vmax.f32 %v2877_v61, 0.0 }
 0x827   : > { %2882 = vst.msk [vmem:[%s509_s3] sm:$0xf] %vm2881_vm3, %v2880_v62 }
 0x82a   : > { %v2878_v38 = vpop.f32.mrf.mxu3 }
 0x82b PF: > { %p3415_p5 = scmp.ge.s32.totalorder %s3789_s23, 2  ;;  %s2941_s29 = sand.u32 1, %s3777_s20  }
 0x82c   : > { %s2942_s10 = scalar_lea.sflag [#allocation4], %s2941_s29 }
 0x82d   : > { %p3412_p7 = pnand %p3415_p5, %p3920_p6 }
 0x82f   : > { %p3413_p8 = pneg %p3412_p7 }
 0x831   : > { %3772 = dma.done.wait (%p3413_p8), %s2942_s10, 64  }
 0x832   : > { %3774 = vsyncadd (%p3413_p8), %s2942_s10, 4294967232  ;;  %s5167_s23 = sld [smem:[#allocation7_spill]]  ;;  %s5170_s20 = smov %s3781_s21 }
 0x833   : > { %s5168_s28 = sld [smem:[#allocation6_spill]] }
 0x834   : > { %s5169_s22 = sld [smem:[#allocation8_spill]] }
 0x838   : > { %p27_p9 = scmp.ge.s32.totalorder %s5167_s23, 4  }
 0x839   : > { %s5171_s21 = smov %s5168_s28 }
 0x83a   :  { %29 = sbr.rel (!%p27_p9) target bundleno = 10 (0xa), region = 123 }
 0x83f   :  { %2948 = vsyncpa [#allocation4], 1 }
 0x840   :  { %2950 = vsyncpa [#allocation4 + $0x1], 1 }

</bundles_post_ra>
